<compile_context>
chip_gen: v7x
topology: tpu7x:2x2x1
jax: 0.10.0
libtpu: 0.0.40
codegen_flags: <defaults>
</compile_context>

<pallas_src>
import functools

import jax
import jax.numpy as jnp
from jax.experimental import pallas as pl
from jax.experimental.pallas import tpu as pltpu

NEG_SLOPE = 0.01  # nn.LeakyReLU default negative_slope


def _vmem_spec():
    # Small problem: whole arrays live in VMEM, single kernel invocation.
    return pl.BlockSpec(memory_space=pltpu.MemorySpace.VMEM)


# --------------------------------------------------------------------------
# Fused kernel:
#   gates  = LeakyReLU(x @ w1 + b1) @ W2i + b2i        (lane-dense, padded)
#   GRU recurrence over T (fully unrolled), h0 = 0
# --------------------------------------------------------------------------
def fused_embed_kernel(x_ref, w1_ref, b1_ref, w2i_ref, b2i_ref,
                       wh_ref, bhn_ref, h_ref, gates_ref,
                       *, seq_len, batch, embed):
    E = embed
    B = batch

    # ---- batched MLP-fc1 + fused (fc2 -> input-gate) projection ----
    x = x_ref[...]                                                   # (T*B, F)
    h1 = jnp.dot(x, w1_ref[...], preferred_element_type=jnp.float32) + b1_ref[...]
    h1 = jnp.where(h1 >= 0.0, h1, NEG_SLOPE * h1)                    # LeakyReLU
    # (T*B, 128) lane-dense gate pre-activations; columns 3E:128 are zero
    # (zero-padded weights/bias) and are never read by the recurrence.
    gates_ref[...] = (jnp.dot(h1, w2i_ref[...], preferred_element_type=jnp.float32)
                      + b2i_ref[...])

    # ---- GRU recurrence (unrolled, static slices into the gate scratch) ----
    wh = wh_ref[...]                                                 # (E, 3E)
    bhn_b = jnp.broadcast_to(bhn_ref[...], (B, E))                   # hoisted
    h = jnp.zeros((B, E), jnp.float32)
    for t in range(seq_len):                                         # static unroll
        g = gates_ref[pl.ds(t * B, B), :]                            # (B, 128)
        gh = jnp.dot(h, wh, preferred_element_type=jnp.float32)      # (B, 3E)
        r = jax.nn.sigmoid(g[:, 0:E] + gh[:, 0:E])
        z = jax.nn.sigmoid(g[:, E:2 * E] + gh[:, E:2 * E])
        n = jnp.tanh(g[:, 2 * E:3 * E] + r * (gh[:, 2 * E:3 * E] + bhn_b))
        h = (1.0 - z) * n + z * h
    h_ref[...] = h


# --------------------------------------------------------------------------
# Module wrapper (parameter setup + glue reshapes in plain JAX)
# --------------------------------------------------------------------------
class FactorVAEEmbedPallas:
    def __init__(self, key, *, data_size=(8, 16, 32), input_channel=1,
                 input_dim=32, embed_dim=32):
        assert data_size[2] == input_dim
        self.data_size = data_size
        self.input_channel = input_channel
        self.input_dim = input_dim
        self.embed_dim = embed_dim

        F, E = input_dim, embed_dim
        ks = jax.random.split(key, 12)

        def init(k, shape, fan_in):
            bound = 1.0 / jnp.sqrt(jnp.float32(fan_in))
            return jax.random.uniform(k, shape, jnp.float32, -bound, bound)

        # Mlp: fc1 (F->E), fc2 (E->E); stored transposed (in, out) for x @ W
        self.w1 = init(ks[0], (F, E), F)
        self.b1 = init(ks[1], (1, E), F)
        self.w2 = init(ks[2], (E, E), E)
        self.b2 = init(ks[3], (1, E), E)

        # GRU weights (stored transposed (in, out)), kept separately for the
        # pure-JAX reference ...
        self.wir = init(ks[4], (E, E), E)
        self.wiz = init(ks[5], (E, E), E)
        self.win = init(ks[6], (E, E), E)
        self.whr = init(ks[7], (E, E), E)
        self.whz = init(ks[8], (E, E), E)
        self.whn = init(ks[9], (E, E), E)
        b_ih = init(ks[10], (3, 1, E), E)
        b_hh = init(ks[11], (3, 1, E), E)
        self.bir, self.biz, self.bin_ = b_ih[0], b_ih[1], b_ih[2]
        self.bhr, self.bhz, self.bhn = b_hh[0], b_hh[1], b_hh[2]

        # ... and fused / bias-folded / lane-padded for the kernel:
        #   W_i  = [W_ir|W_iz|W_in]            (E, 3E)
        #   b_i  = [b_ir+b_hr | b_iz+b_hz | b_in]  (b_hr, b_hz folded in)
        #   W2i  = w2 @ W_i                    (E, 3E)  (fc2 fused in)
        #   b2i  = b2 @ W_i + b_i              (1, 3E)
        #   pad the 3E lane dim up to a multiple of 128 with zeros.
        wi = jnp.concatenate([self.wir, self.wiz, self.win], axis=1)
        bi = jnp.concatenate([self.bir + self.bhr,
                              self.biz + self.bhz,
                              self.bin_], axis=1)
        w2i = self.w2 @ wi
        b2i = self.b2 @ wi + bi
        self.gate_lanes = ((3 * E + 127) // 128) * 128
        pad = self.gate_lanes - 3 * E
        self.w2i = jnp.pad(w2i, ((0, 0), (0, pad)))
        self.b2i = jnp.pad(b2i, ((0, 0), (0, pad)))

        #   W_h = [W_hr|W_hz|W_hn] (E, 3E); b_hn stays separate (inside r*(.))
        self.wh = jnp.concatenate([self.whr, self.whz, self.whn], axis=1)

    def __call__(self, sample):
        N, C, T, S, F = sample.shape
        assert (T, S, F) == self.data_size
        E = self.embed_dim
        B = N * C * S

        # rearrange 'n c t s f -> (n c s) t f', then time-major flatten:
        # row index = t*B + (n c s)   -> single transpose, no post-kernel ones.
        x_tm = jnp.transpose(sample, (2, 0, 1, 3, 4)).reshape(T * B, F)
        x_tm = x_tm.astype(jnp.float32)

        h = pl.pallas_call(
            functools.partial(fused_embed_kernel, seq_len=T, batch=B, embed=E),
            out_shape=jax.ShapeDtypeStruct((B, E), jnp.float32),
            in_specs=[_vmem_spec()] * 7,
            out_specs=_vmem_spec(),
            scratch_shapes=[pltpu.VMEM((T * B, self.gate_lanes), jnp.float32)],
        )(x_tm, self.w1, self.b1, self.w2i, self.b2i, self.wh, self.bhn)

        # rearrange '(n c s) f -> (n c) s f'
        return h.reshape(N * C, S, E)

    # Pure-JAX reference for correctness checking (uses the raw weights)
    def reference(self, sample):
        N, C, T, S, F = sample.shape
        E = self.embed_dim
        B = N * C * S
        x = jnp.transpose(sample, (0, 1, 3, 2, 4)).reshape(B, T, F)
        h1 = x @ self.w1 + self.b1
        h1 = jnp.where(h1 >= 0.0, h1, NEG_SLOPE * h1)
        m = h1 @ self.w2 + self.b2
        h = jnp.zeros((B, E), jnp.float32)
        for t in range(T):
            xt = m[:, t, :]
            r = jax.nn.sigmoid(xt @ self.wir + self.bir + h @ self.whr + self.bhr)
            z = jax.nn.sigmoid(xt @ self.wiz + self.biz + h @ self.whz + self.bhz)
            n = jnp.tanh(xt @ self.win + self.bin_ + r * (h @ self.whn + self.bhn))
            h = (1.0 - z) * n + z * h
        return h.reshape(N * C, S, E)


if __name__ == "__main__":
    key = jax.random.PRNGKey(0)
    k_param, k_data = jax.random.split(key)

    # Small shapes consistent with the module: data_size = (T, S, F)
    N, C, T, S, F = 2, 1, 8, 16, 32
    E = 32

    model = FactorVAEEmbedPallas(k_param, data_size=(T, S, F),
                                 input_channel=C, input_dim=F, embed_dim=E)
    sample = jax.random.normal(k_data, (N, C, T, S, F), jnp.float32)

    out = model(sample)
    out = jax.block_until_ready(out)
    assert out.shape == (N * C, S, E), out.shape

    ref = jax.block_until_ready(model.reference(sample))
    assert jnp.allclose(out, ref, atol=1e-4, rtol=1e-4), \
        float(jnp.max(jnp.abs(out - ref)))

    print("KERNEL_OK")
</pallas_src>

<mosaic_0001>
module attributes {stable_mosaic.version = 11 : i64} {
  func.func @fused_embed_kernel(%arg0: memref<256x32xf32, #tpu.memory_space<vmem>>, %arg1: memref<32x32xf32, #tpu.memory_space<vmem>>, %arg2: memref<1x32xf32, #tpu.memory_space<vmem>>, %arg3: memref<32x128xf32, #tpu.memory_space<vmem>>, %arg4: memref<1x128xf32, #tpu.memory_space<vmem>>, %arg5: memref<32x96xf32, #tpu.memory_space<vmem>>, %arg6: memref<1x32xf32, #tpu.memory_space<vmem>>, %arg7: memref<32x32xf32, #tpu.memory_space<vmem>>, %arg8: memref<256x128xf32, #tpu.memory_space<vmem>>) attributes {dimension_semantics = [], scalar_prefetch = 0 : i64, scratch_operands = 1 : i64, tpu.core_type = #tpu.core_type<tc>} {
    %c0 = arith.constant 0 : index
    %c0_0 = arith.constant 0 : index
    %0 = vector.load %arg0[%c0, %c0_0] : memref<256x32xf32, #tpu.memory_space<vmem>>, vector<256x32xf32>
    %c0_1 = arith.constant 0 : index
    %c0_2 = arith.constant 0 : index
    %1 = vector.load %arg1[%c0_1, %c0_2] : memref<32x32xf32, #tpu.memory_space<vmem>>, vector<32x32xf32>
    %cst = arith.constant dense<0.000000e+00> : vector<256x32xf32>
    %2 = tpu.matmul %0, %1, %cst {dimension_numbers = #tpu.dot_dimension_numbers<[1], [0], [0], [1], [0, 0, 1, 1], [], []>} : vector<256x32xf32>, vector<32x32xf32>, vector<256x32xf32> -> vector<256x32xf32>
    %c0_3 = arith.constant 0 : index
    %c0_4 = arith.constant 0 : index
    %3 = vector.load %arg2[%c0_3, %c0_4] : memref<1x32xf32, #tpu.memory_space<vmem>>, vector<1x32xf32>
    %4 = vector.broadcast %3 : vector<1x32xf32> to vector<256x32xf32>
    %5 = arith.addf %2, %4 : vector<256x32xf32>
    %cst_5 = arith.constant 0.000000e+00 : f32
    %6 = vector.broadcast %cst_5 : f32 to vector<256x32xf32>
    %7 = arith.cmpf oge, %5, %6 : vector<256x32xf32>
    %cst_6 = arith.constant 0.00999999977 : f32
    %8 = vector.broadcast %cst_6 : f32 to vector<256x32xf32>
    %9 = arith.mulf %8, %5 : vector<256x32xf32>
    %10 = arith.select %7, %5, %9 : vector<256x32xi1>, vector<256x32xf32>
    %c0_7 = arith.constant 0 : index
    %c0_8 = arith.constant 0 : index
    %11 = vector.load %arg3[%c0_7, %c0_8] : memref<32x128xf32, #tpu.memory_space<vmem>>, vector<32x128xf32>
    %cst_9 = arith.constant dense<0.000000e+00> : vector<256x128xf32>
    %12 = tpu.matmul %10, %11, %cst_9 {dimension_numbers = #tpu.dot_dimension_numbers<[1], [0], [0], [1], [0, 0, 1, 1], [], []>} : vector<256x32xf32>, vector<32x128xf32>, vector<256x128xf32> -> vector<256x128xf32>
    %c0_10 = arith.constant 0 : index
    %c0_11 = arith.constant 0 : index
    %13 = vector.load %arg4[%c0_10, %c0_11] : memref<1x128xf32, #tpu.memory_space<vmem>>, vector<1x128xf32>
    %14 = vector.broadcast %13 : vector<1x128xf32> to vector<256x128xf32>
    %15 = arith.addf %12, %14 : vector<256x128xf32>
    %c0_12 = arith.constant 0 : index
    %c0_13 = arith.constant 0 : index
    %16 = vector.load %arg8[%c0_12, %c0_13] : memref<256x128xf32, #tpu.memory_space<vmem>>, vector<256x128xf32>
    tpu.vector_store %arg8[%c0_12, %c0_13], %15 {strides = array<i32>} : memref<256x128xf32, #tpu.memory_space<vmem>>, vector<256x128xf32>,
    %c0_14 = arith.constant 0 : index
    %c0_15 = arith.constant 0 : index
    %17 = vector.load %arg5[%c0_14, %c0_15] : memref<32x96xf32, #tpu.memory_space<vmem>>, vector<32x96xf32>
    %c0_16 = arith.constant 0 : index
    %c0_17 = arith.constant 0 : index
    %18 = vector.load %arg6[%c0_16, %c0_17] : memref<1x32xf32, #tpu.memory_space<vmem>>, vector<1x32xf32>
    %19 = vector.shape_cast %18 : vector<1x32xf32> to vector<1x32xf32>
    %20 = vector.broadcast %19 : vector<1x32xf32> to vector<32x32xf32>
    %cst_18 = arith.constant 0.000000e+00 : f32
    %21 = vector.broadcast %cst_18 : f32 to vector<32x32xf32>
    %c0_19 = arith.constant 0 : index
    %c0_20 = arith.constant 0 : index
    %22 = vector.load %arg8[%c0_19, %c0_20] : memref<256x128xf32, #tpu.memory_space<vmem>>, vector<32x128xf32>
    %cst_21 = arith.constant dense<0.000000e+00> : vector<32x96xf32>
    %23 = tpu.matmul %21, %17, %cst_21 {dimension_numbers = #tpu.dot_dimension_numbers<[1], [0], [0], [1], [0, 0, 1, 1], [], []>} : vector<32x32xf32>, vector<32x96xf32>, vector<32x96xf32> -> vector<32x96xf32>
    %24 = vector.extract_strided_slice %22 {offsets = [0, 0], sizes = [32, 32], strides = [1, 1]} : vector<32x128xf32> to vector<32x32xf32>
    %25 = vector.extract_strided_slice %23 {offsets = [0, 0], sizes = [32, 32], strides = [1, 1]} : vector<32x96xf32> to vector<32x32xf32>
    %26 = arith.addf %24, %25 : vector<32x32xf32>
    %27 = arith.negf %26 : vector<32x32xf32>
    %28 = math.exp %27 : vector<32x32xf32>
    %cst_22 = arith.constant 1.000000e+00 : f32
    %29 = vector.broadcast %cst_22 : f32 to vector<32x32xf32>
    %30 = arith.addf %29, %28 : vector<32x32xf32>
    %31 = arith.divf %29, %30 : vector<32x32xf32>
    %32 = vector.extract_strided_slice %22 {offsets = [0, 32], sizes = [32, 32], strides = [1, 1]} : vector<32x128xf32> to vector<32x32xf32>
    %33 = vector.extract_strided_slice %23 {offsets = [0, 32], sizes = [32, 32], strides = [1, 1]} : vector<32x96xf32> to vector<32x32xf32>
    %34 = arith.addf %32, %33 : vector<32x32xf32>
    %35 = arith.negf %34 : vector<32x32xf32>
    %36 = math.exp %35 : vector<32x32xf32>
    %cst_23 = arith.constant 1.000000e+00 : f32
    %37 = vector.broadcast %cst_23 : f32 to vector<32x32xf32>
    %38 = arith.addf %37, %36 : vector<32x32xf32>
    %39 = arith.divf %37, %38 : vector<32x32xf32>
    %40 = vector.extract_strided_slice %22 {offsets = [0, 64], sizes = [32, 32], strides = [1, 1]} : vector<32x128xf32> to vector<32x32xf32>
    %41 = vector.extract_strided_slice %23 {offsets = [0, 64], sizes = [32, 32], strides = [1, 1]} : vector<32x96xf32> to vector<32x32xf32>
    %42 = arith.addf %41, %20 : vector<32x32xf32>
    %43 = arith.mulf %31, %42 : vector<32x32xf32>
    %44 = arith.addf %40, %43 : vector<32x32xf32>
    %45 = math.tanh %44 : vector<32x32xf32>
    %cst_24 = arith.constant 1.000000e+00 : f32
    %46 = vector.broadcast %cst_24 : f32 to vector<32x32xf32>
    %47 = arith.subf %46, %39 : vector<32x32xf32>
    %48 = arith.mulf %47, %45 : vector<32x32xf32>
    %49 = arith.mulf %39, %21 : vector<32x32xf32>
    %50 = arith.addf %48, %49 : vector<32x32xf32>
    %c32 = arith.constant 32 : index
    %c0_25 = arith.constant 0 : index
    %51 = vector.load %arg8[%c32, %c0_25] : memref<256x128xf32, #tpu.memory_space<vmem>>, vector<32x128xf32>
    %cst_26 = arith.constant dense<0.000000e+00> : vector<32x96xf32>
    %52 = tpu.matmul %50, %17, %cst_26 {dimension_numbers = #tpu.dot_dimension_numbers<[1], [0], [0], [1], [0, 0, 1, 1], [], []>} : vector<32x32xf32>, vector<32x96xf32>, vector<32x96xf32> -> vector<32x96xf32>
    %53 = vector.extract_strided_slice %51 {offsets = [0, 0], sizes = [32, 32], strides = [1, 1]} : vector<32x128xf32> to vector<32x32xf32>
    %54 = vector.extract_strided_slice %52 {offsets = [0, 0], sizes = [32, 32], strides = [1, 1]} : vector<32x96xf32> to vector<32x32xf32>
    %55 = arith.addf %53, %54 : vector<32x32xf32>
    %56 = arith.negf %55 : vector<32x32xf32>
    %57 = math.exp %56 : vector<32x32xf32>
    %cst_27 = arith.constant 1.000000e+00 : f32
    %58 = vector.broadcast %cst_27 : f32 to vector<32x32xf32>
    %59 = arith.addf %58, %57 : vector<32x32xf32>
    %60 = arith.divf %58, %59 : vector<32x32xf32>
    %61 = vector.extract_strided_slice %51 {offsets = [0, 32], sizes = [32, 32], strides = [1, 1]} : vector<32x128xf32> to vector<32x32xf32>
    %62 = vector.extract_strided_slice %52 {offsets = [0, 32], sizes = [32, 32], strides = [1, 1]} : vector<32x96xf32> to vector<32x32xf32>
    %63 = arith.addf %61, %62 : vector<32x32xf32>
    %64 = arith.negf %63 : vector<32x32xf32>
    %65 = math.exp %64 : vector<32x32xf32>
    %cst_28 = arith.constant 1.000000e+00 : f32
    %66 = vector.broadcast %cst_28 : f32 to vector<32x32xf32>
    %67 = arith.addf %66, %65 : vector<32x32xf32>
    %68 = arith.divf %66, %67 : vector<32x32xf32>
    %69 = vector.extract_strided_slice %51 {offsets = [0, 64], sizes = [32, 32], strides = [1, 1]} : vector<32x128xf32> to vector<32x32xf32>
    %70 = vector.extract_strided_slice %52 {offsets = [0, 64], sizes = [32, 32], strides = [1, 1]} : vector<32x96xf32> to vector<32x32xf32>
    %71 = arith.addf %70, %20 : vector<32x32xf32>
    %72 = arith.mulf %60, %71 : vector<32x32xf32>
    %73 = arith.addf %69, %72 : vector<32x32xf32>
    %74 = math.tanh %73 : vector<32x32xf32>
    %cst_29 = arith.constant 1.000000e+00 : f32
    %75 = vector.broadcast %cst_29 : f32 to vector<32x32xf32>
    %76 = arith.subf %75, %68 : vector<32x32xf32>
    %77 = arith.mulf %76, %74 : vector<32x32xf32>
    %78 = arith.mulf %68, %50 : vector<32x32xf32>
    %79 = arith.addf %77, %78 : vector<32x32xf32>
    %c64 = arith.constant 64 : index
    %c0_30 = arith.constant 0 : index
    %80 = vector.load %arg8[%c64, %c0_30] : memref<256x128xf32, #tpu.memory_space<vmem>>, vector<32x128xf32>
    %cst_31 = arith.constant dense<0.000000e+00> : vector<32x96xf32>
    %81 = tpu.matmul %79, %17, %cst_31 {dimension_numbers = #tpu.dot_dimension_numbers<[1], [0], [0], [1], [0, 0, 1, 1], [], []>} : vector<32x32xf32>, vector<32x96xf32>, vector<32x96xf32> -> vector<32x96xf32>
    %82 = vector.extract_strided_slice %80 {offsets = [0, 0], sizes = [32, 32], strides = [1, 1]} : vector<32x128xf32> to vector<32x32xf32>
    %83 = vector.extract_strided_slice %81 {offsets = [0, 0], sizes = [32, 32], strides = [1, 1]} : vector<32x96xf32> to vector<32x32xf32>
    %84 = arith.addf %82, %83 : vector<32x32xf32>
    %85 = arith.negf %84 : vector<32x32xf32>
    %86 = math.exp %85 : vector<32x32xf32>
    %cst_32 = arith.constant 1.000000e+00 : f32
    %87 = vector.broadcast %cst_32 : f32 to vector<32x32xf32>
    %88 = arith.addf %87, %86 : vector<32x32xf32>
    %89 = arith.divf %87, %88 : vector<32x32xf32>
    %90 = vector.extract_strided_slice %80 {offsets = [0, 32], sizes = [32, 32], strides = [1, 1]} : vector<32x128xf32> to vector<32x32xf32>
    %91 = vector.extract_strided_slice %81 {offsets = [0, 32], sizes = [32, 32], strides = [1, 1]} : vector<32x96xf32> to vector<32x32xf32>
    %92 = arith.addf %90, %91 : vector<32x32xf32>
    %93 = arith.negf %92 : vector<32x32xf32>
    %94 = math.exp %93 : vector<32x32xf32>
    %cst_33 = arith.constant 1.000000e+00 : f32
    %95 = vector.broadcast %cst_33 : f32 to vector<32x32xf32>
    %96 = arith.addf %95, %94 : vector<32x32xf32>
    %97 = arith.divf %95, %96 : vector<32x32xf32>
    %98 = vector.extract_strided_slice %80 {offsets = [0, 64], sizes = [32, 32], strides = [1, 1]} : vector<32x128xf32> to vector<32x32xf32>
    %99 = vector.extract_strided_slice %81 {offsets = [0, 64], sizes = [32, 32], strides = [1, 1]} : vector<32x96xf32> to vector<32x32xf32>
    %100 = arith.addf %99, %20 : vector<32x32xf32>
    %101 = arith.mulf %89, %100 : vector<32x32xf32>
    %102 = arith.addf %98, %101 : vector<32x32xf32>
    %103 = math.tanh %102 : vector<32x32xf32>
    %cst_34 = arith.constant 1.000000e+00 : f32
    %104 = vector.broadcast %cst_34 : f32 to vector<32x32xf32>
    %105 = arith.subf %104, %97 : vector<32x32xf32>
    %106 = arith.mulf %105, %103 : vector<32x32xf32>
    %107 = arith.mulf %97, %79 : vector<32x32xf32>
    %108 = arith.addf %106, %107 : vector<32x32xf32>
    %c96 = arith.constant 96 : index
    %c0_35 = arith.constant 0 : index
    %109 = vector.load %arg8[%c96, %c0_35] : memref<256x128xf32, #tpu.memory_space<vmem>>, vector<32x128xf32>
    %cst_36 = arith.constant dense<0.000000e+00> : vector<32x96xf32>
    %110 = tpu.matmul %108, %17, %cst_36 {dimension_numbers = #tpu.dot_dimension_numbers<[1], [0], [0], [1], [0, 0, 1, 1], [], []>} : vector<32x32xf32>, vector<32x96xf32>, vector<32x96xf32> -> vector<32x96xf32>
    %111 = vector.extract_strided_slice %109 {offsets = [0, 0], sizes = [32, 32], strides = [1, 1]} : vector<32x128xf32> to vector<32x32xf32>
    %112 = vector.extract_strided_slice %110 {offsets = [0, 0], sizes = [32, 32], strides = [1, 1]} : vector<32x96xf32> to vector<32x32xf32>
    %113 = arith.addf %111, %112 : vector<32x32xf32>
    %114 = arith.negf %113 : vector<32x32xf32>
    %115 = math.exp %114 : vector<32x32xf32>
    %cst_37 = arith.constant 1.000000e+00 : f32
    %116 = vector.broadcast %cst_37 : f32 to vector<32x32xf32>
    %117 = arith.addf %116, %115 : vector<32x32xf32>
    %118 = arith.divf %116, %117 : vector<32x32xf32>
    %119 = vector.extract_strided_slice %109 {offsets = [0, 32], sizes = [32, 32], strides = [1, 1]} : vector<32x128xf32> to vector<32x32xf32>
    %120 = vector.extract_strided_slice %110 {offsets = [0, 32], sizes = [32, 32], strides = [1, 1]} : vector<32x96xf32> to vector<32x32xf32>
    %121 = arith.addf %119, %120 : vector<32x32xf32>
    %122 = arith.negf %121 : vector<32x32xf32>
    %123 = math.exp %122 : vector<32x32xf32>
    %cst_38 = arith.constant 1.000000e+00 : f32
    %124 = vector.broadcast %cst_38 : f32 to vector<32x32xf32>
    %125 = arith.addf %124, %123 : vector<32x32xf32>
    %126 = arith.divf %124, %125 : vector<32x32xf32>
    %127 = vector.extract_strided_slice %109 {offsets = [0, 64], sizes = [32, 32], strides = [1, 1]} : vector<32x128xf32> to vector<32x32xf32>
    %128 = vector.extract_strided_slice %110 {offsets = [0, 64], sizes = [32, 32], strides = [1, 1]} : vector<32x96xf32> to vector<32x32xf32>
    %129 = arith.addf %128, %20 : vector<32x32xf32>
    %130 = arith.mulf %118, %129 : vector<32x32xf32>
    %131 = arith.addf %127, %130 : vector<32x32xf32>
    %132 = math.tanh %131 : vector<32x32xf32>
    %cst_39 = arith.constant 1.000000e+00 : f32
    %133 = vector.broadcast %cst_39 : f32 to vector<32x32xf32>
    %134 = arith.subf %133, %126 : vector<32x32xf32>
    %135 = arith.mulf %134, %132 : vector<32x32xf32>
    %136 = arith.mulf %126, %108 : vector<32x32xf32>
    %137 = arith.addf %135, %136 : vector<32x32xf32>
    %c128 = arith.constant 128 : index
    %c0_40 = arith.constant 0 : index
    %138 = vector.load %arg8[%c128, %c0_40] : memref<256x128xf32, #tpu.memory_space<vmem>>, vector<32x128xf32>
    %cst_41 = arith.constant dense<0.000000e+00> : vector<32x96xf32>
    %139 = tpu.matmul %137, %17, %cst_41 {dimension_numbers = #tpu.dot_dimension_numbers<[1], [0], [0], [1], [0, 0, 1, 1], [], []>} : vector<32x32xf32>, vector<32x96xf32>, vector<32x96xf32> -> vector<32x96xf32>
    %140 = vector.extract_strided_slice %138 {offsets = [0, 0], sizes = [32, 32], strides = [1, 1]} : vector<32x128xf32> to vector<32x32xf32>
    %141 = vector.extract_strided_slice %139 {offsets = [0, 0], sizes = [32, 32], strides = [1, 1]} : vector<32x96xf32> to vector<32x32xf32>
    %142 = arith.addf %140, %141 : vector<32x32xf32>
    %143 = arith.negf %142 : vector<32x32xf32>
    %144 = math.exp %143 : vector<32x32xf32>
    %cst_42 = arith.constant 1.000000e+00 : f32
    %145 = vector.broadcast %cst_42 : f32 to vector<32x32xf32>
    %146 = arith.addf %145, %144 : vector<32x32xf32>
    %147 = arith.divf %145, %146 : vector<32x32xf32>
    %148 = vector.extract_strided_slice %138 {offsets = [0, 32], sizes = [32, 32], strides = [1, 1]} : vector<32x128xf32> to vector<32x32xf32>
    %149 = vector.extract_strided_slice %139 {offsets = [0, 32], sizes = [32, 32], strides = [1, 1]} : vector<32x96xf32> to vector<32x32xf32>
    %150 = arith.addf %148, %149 : vector<32x32xf32>
    %151 = arith.negf %150 : vector<32x32xf32>
    %152 = math.exp %151 : vector<32x32xf32>
    %cst_43 = arith.constant 1.000000e+00 : f32
    %153 = vector.broadcast %cst_43 : f32 to vector<32x32xf32>
    %154 = arith.addf %153, %152 : vector<32x32xf32>
    %155 = arith.divf %153, %154 : vector<32x32xf32>
    %156 = vector.extract_strided_slice %138 {offsets = [0, 64], sizes = [32, 32], strides = [1, 1]} : vector<32x128xf32> to vector<32x32xf32>
    %157 = vector.extract_strided_slice %139 {offsets = [0, 64], sizes = [32, 32], strides = [1, 1]} : vector<32x96xf32> to vector<32x32xf32>
    %158 = arith.addf %157, %20 : vector<32x32xf32>
    %159 = arith.mulf %147, %158 : vector<32x32xf32>
    %160 = arith.addf %156, %159 : vector<32x32xf32>
    %161 = math.tanh %160 : vector<32x32xf32>
    %cst_44 = arith.constant 1.000000e+00 : f32
    %162 = vector.broadcast %cst_44 : f32 to vector<32x32xf32>
    %163 = arith.subf %162, %155 : vector<32x32xf32>
    %164 = arith.mulf %163, %161 : vector<32x32xf32>
    %165 = arith.mulf %155, %137 : vector<32x32xf32>
    %166 = arith.addf %164, %165 : vector<32x32xf32>
    %c160 = arith.constant 160 : index
    %c0_45 = arith.constant 0 : index
    %167 = vector.load %arg8[%c160, %c0_45] : memref<256x128xf32, #tpu.memory_space<vmem>>, vector<32x128xf32>
    %cst_46 = arith.constant dense<0.000000e+00> : vector<32x96xf32>
    %168 = tpu.matmul %166, %17, %cst_46 {dimension_numbers = #tpu.dot_dimension_numbers<[1], [0], [0], [1], [0, 0, 1, 1], [], []>} : vector<32x32xf32>, vector<32x96xf32>, vector<32x96xf32> -> vector<32x96xf32>
    %169 = vector.extract_strided_slice %167 {offsets = [0, 0], sizes = [32, 32], strides = [1, 1]} : vector<32x128xf32> to vector<32x32xf32>
    %170 = vector.extract_strided_slice %168 {offsets = [0, 0], sizes = [32, 32], strides = [1, 1]} : vector<32x96xf32> to vector<32x32xf32>
    %171 = arith.addf %169, %170 : vector<32x32xf32>
    %172 = arith.negf %171 : vector<32x32xf32>
    %173 = math.exp %172 : vector<32x32xf32>
    %cst_47 = arith.constant 1.000000e+00 : f32
    %174 = vector.broadcast %cst_47 : f32 to vector<32x32xf32>
    %175 = arith.addf %174, %173 : vector<32x32xf32>
    %176 = arith.divf %174, %175 : vector<32x32xf32>
    %177 = vector.extract_strided_slice %167 {offsets = [0, 32], sizes = [32, 32], strides = [1, 1]} : vector<32x128xf32> to vector<32x32xf32>
    %178 = vector.extract_strided_slice %168 {offsets = [0, 32], sizes = [32, 32], strides = [1, 1]} : vector<32x96xf32> to vector<32x32xf32>
    %179 = arith.addf %177, %178 : vector<32x32xf32>
    %180 = arith.negf %179 : vector<32x32xf32>
    %181 = math.exp %180 : vector<32x32xf32>
    %cst_48 = arith.constant 1.000000e+00 : f32
    %182 = vector.broadcast %cst_48 : f32 to vector<32x32xf32>
    %183 = arith.addf %182, %181 : vector<32x32xf32>
    %184 = arith.divf %182, %183 : vector<32x32xf32>
    %185 = vector.extract_strided_slice %167 {offsets = [0, 64], sizes = [32, 32], strides = [1, 1]} : vector<32x128xf32> to vector<32x32xf32>
    %186 = vector.extract_strided_slice %168 {offsets = [0, 64], sizes = [32, 32], strides = [1, 1]} : vector<32x96xf32> to vector<32x32xf32>
    %187 = arith.addf %186, %20 : vector<32x32xf32>
    %188 = arith.mulf %176, %187 : vector<32x32xf32>
    %189 = arith.addf %185, %188 : vector<32x32xf32>
    %190 = math.tanh %189 : vector<32x32xf32>
    %cst_49 = arith.constant 1.000000e+00 : f32
    %191 = vector.broadcast %cst_49 : f32 to vector<32x32xf32>
    %192 = arith.subf %191, %184 : vector<32x32xf32>
    %193 = arith.mulf %192, %190 : vector<32x32xf32>
    %194 = arith.mulf %184, %166 : vector<32x32xf32>
    %195 = arith.addf %193, %194 : vector<32x32xf32>
    %c192 = arith.constant 192 : index
    %c0_50 = arith.constant 0 : index
    %196 = vector.load %arg8[%c192, %c0_50] : memref<256x128xf32, #tpu.memory_space<vmem>>, vector<32x128xf32>
    %cst_51 = arith.constant dense<0.000000e+00> : vector<32x96xf32>
    %197 = tpu.matmul %195, %17, %cst_51 {dimension_numbers = #tpu.dot_dimension_numbers<[1], [0], [0], [1], [0, 0, 1, 1], [], []>} : vector<32x32xf32>, vector<32x96xf32>, vector<32x96xf32> -> vector<32x96xf32>
    %198 = vector.extract_strided_slice %196 {offsets = [0, 0], sizes = [32, 32], strides = [1, 1]} : vector<32x128xf32> to vector<32x32xf32>
    %199 = vector.extract_strided_slice %197 {offsets = [0, 0], sizes = [32, 32], strides = [1, 1]} : vector<32x96xf32> to vector<32x32xf32>
    %200 = arith.addf %198, %199 : vector<32x32xf32>
    %201 = arith.negf %200 : vector<32x32xf32>
    %202 = math.exp %201 : vector<32x32xf32>
    %cst_52 = arith.constant 1.000000e+00 : f32
    %203 = vector.broadcast %cst_52 : f32 to vector<32x32xf32>
    %204 = arith.addf %203, %202 : vector<32x32xf32>
    %205 = arith.divf %203, %204 : vector<32x32xf32>
    %206 = vector.extract_strided_slice %196 {offsets = [0, 32], sizes = [32, 32], strides = [1, 1]} : vector<32x128xf32> to vector<32x32xf32>
    %207 = vector.extract_strided_slice %197 {offsets = [0, 32], sizes = [32, 32], strides = [1, 1]} : vector<32x96xf32> to vector<32x32xf32>
    %208 = arith.addf %206, %207 : vector<32x32xf32>
    %209 = arith.negf %208 : vector<32x32xf32>
    %210 = math.exp %209 : vector<32x32xf32>
    %cst_53 = arith.constant 1.000000e+00 : f32
    %211 = vector.broadcast %cst_53 : f32 to vector<32x32xf32>
    %212 = arith.addf %211, %210 : vector<32x32xf32>
    %213 = arith.divf %211, %212 : vector<32x32xf32>
    %214 = vector.extract_strided_slice %196 {offsets = [0, 64], sizes = [32, 32], strides = [1, 1]} : vector<32x128xf32> to vector<32x32xf32>
    %215 = vector.extract_strided_slice %197 {offsets = [0, 64], sizes = [32, 32], strides = [1, 1]} : vector<32x96xf32> to vector<32x32xf32>
    %216 = arith.addf %215, %20 : vector<32x32xf32>
    %217 = arith.mulf %205, %216 : vector<32x32xf32>
    %218 = arith.addf %214, %217 : vector<32x32xf32>
    %219 = math.tanh %218 : vector<32x32xf32>
    %cst_54 = arith.constant 1.000000e+00 : f32
    %220 = vector.broadcast %cst_54 : f32 to vector<32x32xf32>
    %221 = arith.subf %220, %213 : vector<32x32xf32>
    %222 = arith.mulf %221, %219 : vector<32x32xf32>
    %223 = arith.mulf %213, %195 : vector<32x32xf32>
    %224 = arith.addf %222, %223 : vector<32x32xf32>
    %c224 = arith.constant 224 : index
    %c0_55 = arith.constant 0 : index
    %225 = vector.load %arg8[%c224, %c0_55] : memref<256x128xf32, #tpu.memory_space<vmem>>, vector<32x128xf32>
    %cst_56 = arith.constant dense<0.000000e+00> : vector<32x96xf32>
    %226 = tpu.matmul %224, %17, %cst_56 {dimension_numbers = #tpu.dot_dimension_numbers<[1], [0], [0], [1], [0, 0, 1, 1], [], []>} : vector<32x32xf32>, vector<32x96xf32>, vector<32x96xf32> -> vector<32x96xf32>
    %227 = vector.extract_strided_slice %225 {offsets = [0, 0], sizes = [32, 32], strides = [1, 1]} : vector<32x128xf32> to vector<32x32xf32>
    %228 = vector.extract_strided_slice %226 {offsets = [0, 0], sizes = [32, 32], strides = [1, 1]} : vector<32x96xf32> to vector<32x32xf32>
    %229 = arith.addf %227, %228 : vector<32x32xf32>
    %230 = arith.negf %229 : vector<32x32xf32>
    %231 = math.exp %230 : vector<32x32xf32>
    %cst_57 = arith.constant 1.000000e+00 : f32
    %232 = vector.broadcast %cst_57 : f32 to vector<32x32xf32>
    %233 = arith.addf %232, %231 : vector<32x32xf32>
    %234 = arith.divf %232, %233 : vector<32x32xf32>
    %235 = vector.extract_strided_slice %225 {offsets = [0, 32], sizes = [32, 32], strides = [1, 1]} : vector<32x128xf32> to vector<32x32xf32>
    %236 = vector.extract_strided_slice %226 {offsets = [0, 32], sizes = [32, 32], strides = [1, 1]} : vector<32x96xf32> to vector<32x32xf32>
    %237 = arith.addf %235, %236 : vector<32x32xf32>
    %238 = arith.negf %237 : vector<32x32xf32>
    %239 = math.exp %238 : vector<32x32xf32>
    %cst_58 = arith.constant 1.000000e+00 : f32
    %240 = vector.broadcast %cst_58 : f32 to vector<32x32xf32>
    %241 = arith.addf %240, %239 : vector<32x32xf32>
    %242 = arith.divf %240, %241 : vector<32x32xf32>
    %243 = vector.extract_strided_slice %225 {offsets = [0, 64], sizes = [32, 32], strides = [1, 1]} : vector<32x128xf32> to vector<32x32xf32>
    %244 = vector.extract_strided_slice %226 {offsets = [0, 64], sizes = [32, 32], strides = [1, 1]} : vector<32x96xf32> to vector<32x32xf32>
    %245 = arith.addf %244, %20 : vector<32x32xf32>
    %246 = arith.mulf %234, %245 : vector<32x32xf32>
    %247 = arith.addf %243, %246 : vector<32x32xf32>
    %248 = math.tanh %247 : vector<32x32xf32>
    %cst_59 = arith.constant 1.000000e+00 : f32
    %249 = vector.broadcast %cst_59 : f32 to vector<32x32xf32>
    %250 = arith.subf %249, %242 : vector<32x32xf32>
    %251 = arith.mulf %250, %248 : vector<32x32xf32>
    %252 = arith.mulf %242, %224 : vector<32x32xf32>
    %253 = arith.addf %251, %252 : vector<32x32xf32>
    %c0_60 = arith.constant 0 : index
    %c0_61 = arith.constant 0 : index
    %254 = vector.load %arg7[%c0_60, %c0_61] : memref<32x32xf32, #tpu.memory_space<vmem>>, vector<32x32xf32>
    tpu.vector_store %arg7[%c0_60, %c0_61], %253 {strides = array<i32>} : memref<32x32xf32, #tpu.memory_space<vmem>>, vector<32x32xf32>,
    return
  }
}

</mosaic_0001>

<bundles_post_ra>
// kernel: tpu_custom_call.1
= control target key start
LH: loop header
LB: loop body
LE: loop exit
PB: predicated region body
PF: predicated region fallthrough
CT: control target
= control target key end

     0   :  { %vm70_vm0 = vcmask 261120   ;;  %s4231_s0 = inlined_call_operand.vmem [shape: f32[256,32], index: 0, kind: input, shape index: {}]   ;;  %s4232_s1 = inlined_call_operand.vmem [shape: f32[32,32], index: 1, kind: input, shape index: {}]   ;;  %s4233_s2 = inlined_call_operand.vmem [shape: f32[1,32], index: 2, kind: input, shape index: {}]   ;;  %s4234_s3 = inlined_call_operand.vmem [shape: f32[32,128], index: 3, kind: input, shape index: {}]   ;;  %s4235_s4 = inlined_call_operand.vmem [shape: f32[1,128], index: 4, kind: input, shape index: {}]   ;;  %s4236_s5 = inlined_call_operand.vmem [shape: f32[32,96], index: 5, kind: input, shape index: {}]   ;;  %s4237_s6 = inlined_call_operand.vmem [shape: f32[1,32], index: 6, kind: input, shape index: {}]   ;;  %s4238_s7 = inlined_call_operand.hbm [shape: f32[32,32], index: 7, kind: output, shape index: {}]  }
   0x1   :  { %v59_v0 = vld [vmem:[%s4232_s1] sm:$0xff]  ;;  %v60_v1 = vld [vmem:[%s4232_s1 + $0x8] sm:$0xff]  ;;  %v61_v2 = vld [vmem:[%s4232_s1 + $0x10] sm:$0xff] }
   0x2   :  { %v3107_v3 = vpack.c.bf16 %v60_v1, %v59_v0  ;;  %v62_v4 = vld [vmem:[%s4232_s1 + $0x18] sm:$0xff]  ;;  %v27_v5 = vld [vmem:[%s4231_s0] sm:$0xff]  ;;  %v853_v8 = vld [vmem:[%s4236_s5 + $0x8] sm:$0xff] }
   0x3   :  { %v3111_v6 = vpack.c.bf16 %v62_v4, %v61_v2  ;;  %2891 = vmatprep.mubr.msk.f32.mxu0 %vm70_vm0, %v27_v5  ;;  %v852_v7 = vld [vmem:[%s4236_s5] sm:$0xff]  ;;  %v28_v10 = vld [vmem:[%s4231_s0 + $0x8] sm:$0xff]  ;;  %v854_v11 = vld [vmem:[%s4236_s5 + $0x10] sm:$0xff] }
   0x4   :  { %3108 = vmatprep.subr.bf16.mxu0 %v3107_v3  ;;  %v3477_v9 = vpack.c.bf16 %v853_v8, %v852_v7  ;;  %v29_v12 = vld [vmem:[%s4231_s0 + $0x10] sm:$0xff]  ;;  %v855_v13 = vld [vmem:[%s4236_s5 + $0x18] sm:$0xff]  ;;  %v31_v16 = vld [vmem:[%s4231_s0 + $0x20] sm:$0xff] }
   0x5   :  { %3110 = vmatpush3.bf16.msra.mxu0 %v3107_v3  ;;  %v3492_v14 = vpack.c.bf16 %v855_v13, %v854_v11  ;;  %v30_v15 = vld [vmem:[%s4231_s0 + $0x18] sm:$0xff] }
   0x6   :  { %3112 = vmatprep.subr.bf16.mxu0 %v3111_v6 }
   0x9   :  { %3114 = vmatpush3.bf16.msra.mxu0 %v3111_v6 }
   0xa   :  { %3124 = vmatprep.subr.bf16.mxu0 %v3477_v9 }
   0xc   :  { %2892 = vmatmul.mubr.msk.f32.vlgmr.msra.gmra.mrb[0].mxu0 %vm70_vm0, %v28_v10 }
   0xd   :  { %2894 = vmatprep.mubr.msk.f32.mxu0 %vm70_vm0, %v29_v12  ;;  %3126 = vmatpush3.bf16.msra.mxu0 %v3477_v9 }
   0xe   :  { %3128 = vmatprep.subr.bf16.mxu0 %v3492_v14 }
   0xf   :  { %12 = vsyncpa [#allocation4], 0  ;;  %v32_v17 = vld [vmem:[%s4231_s0 + $0x28] sm:$0xff]  ;;  %v33_v18 = vld [vmem:[%s4231_s0 + $0x30] sm:$0xff]  ;;  %v3409_v44 = vmov 0.0   ;;  %s3410_s1 = smov 64  }
  0x10   :  { %2895 = vmatmul.mubr.msk.f32.gmra.mrb[2].mxu0 %vm70_vm0, %v30_v15  ;;  %v34_v19 = vld [vmem:[%s4231_s0 + $0x38] sm:$0xff]  ;;  %v35_v20 = vld [vmem:[%s4231_s0 + $0x40] sm:$0xff]  ;;  %v36_v21 = vld [vmem:[%s4231_s0 + $0x48] sm:$0xff] }
  0x11   :  { %2897 = vmatprep.mubr.msk.f32.mxu0 %vm70_vm0, %v31_v16  ;;  %3130 = vmatpush3.bf16.msra.mxu0 %v3492_v14  ;;  %v37_v22 = vld [vmem:[%s4231_s0 + $0x50] sm:$0xff]  ;;  %v38_v23 = vld [vmem:[%s4231_s0 + $0x58] sm:$0xff]  ;;  %v39_v24 = vld [vmem:[%s4231_s0 + $0x60] sm:$0xff] }
  0x12   :  { %3140 = vmatprep.subr.bf16.mxu0 %v3477_v9  ;;  %v40_v25 = vld [vmem:[%s4231_s0 + $0x68] sm:$0xff]  ;;  %v41_v26 = vld [vmem:[%s4231_s0 + $0x70] sm:$0xff]  ;;  %v42_v27 = vld [vmem:[%s4231_s0 + $0x78] sm:$0xff] }
  0x13   :  { %v43_v28 = vld [vmem:[%s4231_s0 + $0x80] sm:$0xff]  ;;  %v44_v29 = vld [vmem:[%s4231_s0 + $0x88] sm:$0xff]  ;;  %v45_v30 = vld [vmem:[%s4231_s0 + $0x90] sm:$0xff] }
  0x14   :  { %2898 = vmatmul.mubr.msk.f32.gmra.mrb[4].mxu0 %vm70_vm0, %v32_v17  ;;  %v46_v31 = vld [vmem:[%s4231_s0 + $0x98] sm:$0xff]  ;;  %v47_v32 = vld [vmem:[%s4231_s0 + $0xa0] sm:$0xff]  ;;  %v48_v33 = vld [vmem:[%s4231_s0 + $0xa8] sm:$0xff] }
  0x15   :  { %2900 = vmatprep.mubr.msk.f32.mxu0 %vm70_vm0, %v33_v18  ;;  %v49_v34 = vld [vmem:[%s4231_s0 + $0xb0] sm:$0xff]  ;;  %v50_v35 = vld [vmem:[%s4231_s0 + $0xb8] sm:$0xff]  ;;  %v51_v36 = vld [vmem:[%s4231_s0 + $0xc0] sm:$0xff] }
  0x16   :  { %v52_v37 = vld [vmem:[%s4231_s0 + $0xc8] sm:$0xff]  ;;  %v53_v38 = vld [vmem:[%s4231_s0 + $0xd0] sm:$0xff]  ;;  %v54_v39 = vld [vmem:[%s4231_s0 + $0xd8] sm:$0xff] }
  0x17   :  { %v55_v40 = vld [vmem:[%s4231_s0 + $0xe0] sm:$0xff]  ;;  %v56_v41 = vld [vmem:[%s4231_s0 + $0xe8] sm:$0xff]  ;;  %v57_v42 = vld [vmem:[%s4231_s0 + $0xf0] sm:$0xff] }
  0x18   :  { %2901 = vmatmul.mubr.msk.f32.gmra.mrb[6].mxu0 %vm70_vm0, %v34_v19  ;;  %v58_v43 = vld [vmem:[%s4231_s0 + $0xf8] sm:$0xff]  ;;  %v488_v45 = vld [vmem:[%s4234_s3] sm:$0xff]  ;;  %v489_v46 = vld [vmem:[%s4234_s3 + $0x8] sm:$0xff] }
  0x19   :  { %2903 = vmatprep.mubr.msk.f32.mxu0 %vm70_vm0, %v35_v20  ;;  %v3115_v47 = vpack.c.bf16 %v489_v46, %v488_v45  ;;  %v490_v48 = vld [vmem:[%s4234_s3 + $0x10] sm:$0xff]  ;;  %v491_v49 = vld [vmem:[%s4234_s3 + $0x18] sm:$0xff]  ;;  %v2686_v51 = vld [vmem:[%s4237_s6] ss:$0 sm:$0xff]  ;;  %s3412_s6 = smov [#allocation3]  }
  0x1a   :  { %v3119_v50 = vpack.c.bf16 %v491_v49, %v490_v48  ;;  %982 = vrot.lane.b32.xlu0 %v2686_v51, %s3410_s1  ;;  %v3640_v52 = vld [vmem:[%s4233_s2] ss:$0 sm:$0xff]  ;;  %s2609_s17 = sshll.u32 %s3412_s6, 4  ;;  %s2610_s17 = int_to_ptr.vmem [resolvable:$true] %s2609_s17 }
  0x1b   :  { %3116 = vmatprep.subr.bf16.mxu1 %v3115_v47  ;;  %s3385_s18 = scalar_lea.vmem %s2610_s17, 512  ;;  %p3390_p1 = scmp.lt.s32.totalorder %s2610_s17, %s2610_s17 }
  0x1c   :  { %2904 = vmatmul.mubr.msk.f32.gmra.mrb[8].mxu0 %vm70_vm0, %v36_v21  ;;  %3118 = vmatpush3.bf16.msra.mxu1 %v3115_v47  ;;  %p3386_p0 = scmp.ne.s32.totalorder %s2610_s17, %s3385_s18  ;;  %p3391_p2 = scmp.lt.s32.totalorder %s3385_s18, %s3385_s18 }
  0x1d   :  { %2906 = vmatprep.mubr.msk.f32.mxu0 %vm70_vm0, %v37_v22  ;;  %3120 = vmatprep.subr.bf16.mxu1 %v3119_v50 }
  0x1e   :  { %p3392_p3 = por %p3391_p2, %p3390_p1 }
  0x20   :  { %2907 = vmatmul.mubr.msk.f32.gmra.mrb[10].mxu0 %vm70_vm0, %v38_v23  ;;  %3122 = vmatpush3.bf16.msra.mxu1 %v3119_v50  ;;  %p3393_p4 = pnand %p3392_p3, %p3386_p0 }
  0x21   :  { %2909 = vmatprep.mubr.msk.f32.mxu0 %vm70_vm0, %v39_v24  ;;  %3132 = vmatprep.subr.bf16.mxu1 %v3477_v9 }
  0x24   :  { %2910 = vmatmul.mubr.msk.f32.gmra.mrb[12].mxu0 %vm70_vm0, %v40_v25 }
  0x25   :  { %2912 = vmatprep.mubr.msk.f32.mxu0 %vm70_vm0, %v41_v26 }
  0x28   :  { %2913 = vmatmul.mubr.msk.f32.gmra.mrb[14].mxu0 %vm70_vm0, %v42_v27 }
  0x29   :  { %2915 = vmatprep.mubr.msk.f32.mxu0 %vm70_vm0, %v43_v28 }
  0x2c   :  { %2916 = vmatmul.mubr.msk.f32.gmra.mrb[16].mxu0 %vm70_vm0, %v44_v29 }
  0x2d   :  { %2918 = vmatprep.mubr.msk.f32.mxu0 %vm70_vm0, %v45_v30 }
  0x30   :  { %2919 = vmatmul.mubr.msk.f32.gmra.mrb[18].mxu0 %vm70_vm0, %v46_v31 }
  0x31   :  { %2921 = vmatprep.mubr.msk.f32.mxu0 %vm70_vm0, %v47_v32 }
  0x34   :  { %2922 = vmatmul.mubr.msk.f32.gmra.mrb[20].mxu0 %vm70_vm0, %v48_v33 }
  0x35   :  { %2924 = vmatprep.mubr.msk.f32.mxu0 %vm70_vm0, %v49_v34 }
  0x38   :  { %2925 = vmatmul.mubr.msk.f32.gmra.mrb[22].mxu0 %vm70_vm0, %v50_v35 }
  0x39   :  { %2927 = vmatprep.mubr.msk.f32.mxu0 %vm70_vm0, %v51_v36 }
  0x3c   :  { %2928 = vmatmul.mubr.msk.f32.gmra.mrb[24].mxu0 %vm70_vm0, %v52_v37 }
  0x3d   :  { %2930 = vmatprep.mubr.msk.f32.mxu0 %vm70_vm0, %v53_v38 }
  0x40   :  { %2931 = vmatmul.mubr.msk.f32.gmra.mrb[26].mxu0 %vm70_vm0, %v54_v39 }
  0x41   :  { %2933 = vmatprep.mubr.msk.f32.mxu0 %vm70_vm0, %v55_v40 }
  0x44   :  { %2934 = vmatmul.mubr.msk.f32.gmra.mrb[28].mxu0 %vm70_vm0, %v56_v41 }
  0x45   :  { %2936 = vmatprep.mubr.msk.f32.mxu0 %vm70_vm0, %v57_v42 }
  0x48   :  { %2937 = vmatmul.mubr.msk.f32.gmra.mrb[30].mxu0 %vm70_vm0, %v58_v43 }
  0x49   :  { %3003 = vmatprep.mubr.f32.mxu0 %v3409_v44 }
  0x4c   :  { %3004 = vmatmul.mubr.f32.vlgmr.msra.gmra.mrb[32].mxu0 %v3409_v44 }
  0x4d   :  { %3006 = vmatprep.mubr.f32.mxu0 %v3409_v44  ;;  %3142 = vmatpush3.bf16.msra.mxu0 %v3477_v9 }
  0x4e   :  { %3144 = vmatprep.subr.bf16.mxu0 %v3492_v14 }
  0x50   :  { %3007 = vmatmul.mubr.f32.gmra.mrb[34].mxu0 %v3409_v44 }
  0x51   :  { %3146 = vmatpush3.bf16.msra.mxu0 %v3492_v14 }
  0x52   :  { %3156 = vmatprep.subr.bf16.mxu0 %v3477_v9 }
  0xdf   :  { %v2893_v53 = vpop.f32.mrb[0].mxu0 }
  0xe0   :  { %v239_v54 = vadd.f32 %v2893_v53, %v3640_v52  ;;  %v233_v55 = vpop.f32.mrb[1].mxu0 }
  0xe1   :  { %v234_v56 = vadd.f32 %v3640_v52, %v233_v55 }
  0xe2   :  { %v425_v57 = vmul.f32 0.01, %v239_v54  ;;  %vm393_vm1 = vcmp.ge.f32.partialorder %v239_v54, 0.0 }
  0xe3   :  { %v2896_v58 = vpop.f32.mrb[2].mxu0  ;;  %vm392_vm2 = vcmp.ge.f32.partialorder %v234_v56, 0.0  ;;  %v424_v59 = vmul.f32 0.01, %v234_v56 }
  0xe4   :  { %v249_v60 = vadd.f32 %v2896_v58, %v3640_v52  ;;  %v243_v61 = vpop.f32.mrb[3].mxu0  ;;  %v457_v1 = vsel %vm393_vm1, %v239_v54, %v425_v57 }
  0xe5   :  { %v244_v62 = vadd.f32 %v3640_v52, %v243_v61  ;;  %v456_v63 = vsel %vm392_vm2, %v234_v56, %v424_v59 }
  0xe6   :  { %v427_v0 = vmul.f32 0.01, %v249_v60  ;;  %2947 = vmatprep.mubr.msk.f32.mxu1 %vm70_vm0, %v456_v63  ;;  %vm395_vm3 = vcmp.ge.f32.partialorder %v249_v60, 0.0 }
  0xe7   :  { %vm394_vm4 = vcmp.ge.f32.partialorder %v244_v62, 0.0  ;;  %v426_v2 = vmul.f32 0.01, %v244_v62  ;;  %2948 = vmatmul.mubr.msk.f32.vlgmr.msra.gmra.mrb[0].mxu1 %vm70_vm0, %v457_v1  ;;  %v2899_v3 = vpop.f32.mrb[4].mxu0 }
  0xe8   :  { %v259_v4 = vadd.f32 %v2899_v3, %v3640_v52  ;;  %v253_v5 = vpop.f32.mrb[5].mxu0  ;;  %3134 = vmatpush3.bf16.msra.mxu1 %v3477_v9  ;;  %v459_v8 = vsel %vm395_vm3, %v249_v60, %v427_v0 }
  0xe9   :  { %v458_v6 = vsel %vm394_vm4, %v244_v62, %v426_v2  ;;  %v254_v7 = vadd.f32 %v3640_v52, %v253_v5  ;;  %3136 = vmatprep.subr.bf16.mxu1 %v3492_v14 }
  0xea   :  { %2950 = vmatprep.mubr.msk.f32.mxu1 %vm70_vm0, %v458_v6  ;;  %vm397_vm5 = vcmp.ge.f32.partialorder %v259_v4, 0.0  ;;  %v429_v10 = vmul.f32 0.01, %v259_v4 }
  0xeb   :  { %2951 = vmatmul.mubr.msk.f32.gmra.mrb[2].mxu1 %vm70_vm0, %v459_v8  ;;  %vm396_vm6 = vcmp.ge.f32.partialorder %v254_v7, 0.0  ;;  %v428_v11 = vmul.f32 0.01, %v254_v7  ;;  %v2902_v12 = vpop.f32.mrb[6].mxu0 }
  0xec   :  { %v269_v13 = vadd.f32 %v2902_v12, %v3640_v52  ;;  %v263_v15 = vpop.f32.mrb[7].mxu0  ;;  %v461_v16 = vsel %vm397_vm5, %v259_v4, %v429_v10  ;;  %3138 = vmatpush3.bf16.msra.mxu1 %v3492_v14 }
  0xed   :  { %v264_v17 = vadd.f32 %v3640_v52, %v263_v15  ;;  %v460_v18 = vsel %vm396_vm6, %v254_v7, %v428_v11  ;;  %3148 = vmatprep.subr.bf16.mxu1 %v3477_v9 }
  0xee   :  { %vm399_vm7 = vcmp.ge.f32.partialorder %v269_v13, 0.0  ;;  %v431_v19 = vmul.f32 0.01, %v269_v13  ;;  %2953 = vmatprep.mubr.msk.f32.mxu1 %vm70_vm0, %v460_v18 }
  0xef   :  { %vm398_vm8 = vcmp.ge.f32.partialorder %v264_v17, 0.0  ;;  %v430_v20 = vmul.f32 0.01, %v264_v17  ;;  %v2905_v21 = vpop.f32.mrb[8].mxu0  ;;  %2954 = vmatmul.mubr.msk.f32.gmra.mrb[4].mxu1 %vm70_vm0, %v461_v16 }
  0xf0   :  { %v279_v22 = vadd.f32 %v2905_v21, %v3640_v52  ;;  %v273_v23 = vpop.f32.mrb[9].mxu0  ;;  %v463_v24 = vsel %vm399_vm7, %v269_v13, %v431_v19 }
  0xf1   :  { %v274_v25 = vadd.f32 %v3640_v52, %v273_v23  ;;  %v462_v26 = vsel %vm398_vm8, %v264_v17, %v430_v20 }
  0xf2   :  { %vm401_vm9 = vcmp.ge.f32.partialorder %v279_v22, 0.0  ;;  %v433_v27 = vmul.f32 0.01, %v279_v22  ;;  %2956 = vmatprep.mubr.msk.f32.mxu1 %vm70_vm0, %v462_v26 }
  0xf3   :  { %vm400_vm10 = vcmp.ge.f32.partialorder %v274_v25, 0.0  ;;  %v432_v28 = vmul.f32 0.01, %v274_v25  ;;  %v2908_v29 = vpop.f32.mrb[10].mxu0  ;;  %2957 = vmatmul.mubr.msk.f32.gmra.mrb[6].mxu1 %vm70_vm0, %v463_v24 }
  0xf4   :  { %v289_v30 = vadd.f32 %v2908_v29, %v3640_v52  ;;  %v283_v31 = vpop.f32.mrb[11].mxu0  ;;  %v465_v32 = vsel %vm401_vm9, %v279_v22, %v433_v27 }
  0xf5   :  { %v284_v33 = vadd.f32 %v3640_v52, %v283_v31  ;;  %v464_v34 = vsel %vm400_vm10, %v274_v25, %v432_v28 }
  0xf6   :  { %vm403_vm11 = vcmp.ge.f32.partialorder %v289_v30, 0.0  ;;  %v435_v35 = vmul.f32 0.01, %v289_v30  ;;  %2959 = vmatprep.mubr.msk.f32.mxu1 %vm70_vm0, %v464_v34 }
  0xf7   :  { %vm402_vm12 = vcmp.ge.f32.partialorder %v284_v33, 0.0  ;;  %v434_v36 = vmul.f32 0.01, %v284_v33  ;;  %v2911_v37 = vpop.f32.mrb[12].mxu0  ;;  %2960 = vmatmul.mubr.msk.f32.gmra.mrb[8].mxu1 %vm70_vm0, %v465_v32 }
  0xf8   :  { %v299_v38 = vadd.f32 %v2911_v37, %v3640_v52  ;;  %v293_v39 = vpop.f32.mrb[13].mxu0  ;;  %v467_v40 = vsel %vm403_vm11, %v289_v30, %v435_v35 }
  0xf9   :  { %v294_v41 = vadd.f32 %v3640_v52, %v293_v39  ;;  %v466_v42 = vsel %vm402_vm12, %v284_v33, %v434_v36 }
  0xfa   :  { %vm405_vm13 = vcmp.ge.f32.partialorder %v299_v38, 0.0  ;;  %v437_v43 = vmul.f32 0.01, %v299_v38  ;;  %2962 = vmatprep.mubr.msk.f32.mxu1 %vm70_vm0, %v466_v42 }
  0xfb   :  { %vm404_vm14 = vcmp.ge.f32.partialorder %v294_v41, 0.0  ;;  %v436_v44 = vmul.f32 0.01, %v294_v41  ;;  %v2914_v45 = vpop.f32.mrb[14].mxu0  ;;  %2963 = vmatmul.mubr.msk.f32.gmra.mrb[10].mxu1 %vm70_vm0, %v467_v40 }
  0xfc   :  { %v309_v46 = vadd.f32 %v2914_v45, %v3640_v52  ;;  %v303_v47 = vpop.f32.mrb[15].mxu0  ;;  %v469_v48 = vsel %vm405_vm13, %v299_v38, %v437_v43 }
  0xfd   :  { %v304_v49 = vadd.f32 %v3640_v52, %v303_v47  ;;  %v468_v50 = vsel %vm404_vm14, %v294_v41, %v436_v44 }
  0xfe   :  { %vm407_vm15 = vcmp.ge.f32.partialorder %v309_v46, 0.0  ;;  %v439_v51 = vmul.f32 0.01, %v309_v46  ;;  %2965 = vmatprep.mubr.msk.f32.mxu1 %vm70_vm0, %v468_v50 }
  0xff   :  { %vm406_vm1 = vcmp.ge.f32.partialorder %v304_v49, 0.0  ;;  %v438_v53 = vmul.f32 0.01, %v304_v49  ;;  %v2917_v54 = vpop.f32.mrb[16].mxu0  ;;  %2966 = vmatmul.mubr.msk.f32.gmra.mrb[12].mxu1 %vm70_vm0, %v469_v48 }
 0x100   :  { %v319_v55 = vadd.f32 %v2917_v54, %v3640_v52  ;;  %v313_v56 = vpop.f32.mrb[17].mxu0  ;;  %v471_v57 = vsel %vm407_vm15, %v309_v46, %v439_v51 }
 0x101   :  { %v314_v58 = vadd.f32 %v3640_v52, %v313_v56  ;;  %v470_v59 = vsel %vm406_vm1, %v304_v49, %v438_v53 }
 0x102   :  { %vm409_vm2 = vcmp.ge.f32.partialorder %v319_v55, 0.0  ;;  %v441_v60 = vmul.f32 0.01, %v319_v55  ;;  %2968 = vmatprep.mubr.msk.f32.mxu1 %vm70_vm0, %v470_v59 }
 0x103   :  { %vm408_vm3 = vcmp.ge.f32.partialorder %v314_v58, 0.0  ;;  %v440_v61 = vmul.f32 0.01, %v314_v58  ;;  %v2920_v62 = vpop.f32.mrb[18].mxu0  ;;  %2969 = vmatmul.mubr.msk.f32.gmra.mrb[14].mxu1 %vm70_vm0, %v471_v57 }
 0x104   :  { %v329_v63 = vadd.f32 %v2920_v62, %v3640_v52  ;;  %v323_v0 = vpop.f32.mrb[19].mxu0  ;;  %v473_v1 = vsel %vm409_vm2, %v319_v55, %v441_v60  ;;  %v3706_v55 = vpop.permute.xlu0 %982 }
 0x105   :  { %v324_v2 = vadd.f32 %v3640_v52, %v323_v0  ;;  %v472_v3 = vsel %vm408_vm3, %v314_v58, %v440_v61 }
 0x106   :  { %vm411_vm4 = vcmp.ge.f32.partialorder %v329_v63, 0.0  ;;  %v443_v4 = vmul.f32 0.01, %v329_v63  ;;  %2971 = vmatprep.mubr.msk.f32.mxu1 %vm70_vm0, %v472_v3  ;;  %v3723_v3 = vld [vmem:[%s4235_s4] ss:$0 sm:$0xff]  ;;  %s3411_s4 = smov 96  }
 0x107   :  { %vm410_vm5 = vcmp.ge.f32.partialorder %v324_v2, 0.0  ;;  %v442_v5 = vmul.f32 0.01, %v324_v2  ;;  %v2923_v6 = vpop.f32.mrb[20].mxu0  ;;  %2972 = vmatmul.mubr.msk.f32.gmra.mrb[16].mxu1 %vm70_vm0, %v473_v1 }
 0x108   :  { %v339_v7 = vadd.f32 %v2923_v6, %v3640_v52  ;;  %v333_v8 = vpop.f32.mrb[21].mxu0  ;;  %v475_v10 = vsel %vm411_vm4, %v329_v63, %v443_v4 }
 0x109   :  { %v334_v11 = vadd.f32 %v3640_v52, %v333_v8  ;;  %v474_v12 = vsel %vm410_vm5, %v324_v2, %v442_v5 }
 0x10a   :  { %vm413_vm6 = vcmp.ge.f32.partialorder %v339_v7, 0.0  ;;  %v445_v13 = vmul.f32 0.01, %v339_v7  ;;  %2974 = vmatprep.mubr.msk.f32.mxu1 %vm70_vm0, %v474_v12 }
 0x10b   :  { %vm412_vm7 = vcmp.ge.f32.partialorder %v334_v11, 0.0  ;;  %v444_v15 = vmul.f32 0.01, %v334_v11  ;;  %v2926_v16 = vpop.f32.mrb[22].mxu0  ;;  %2975 = vmatmul.mubr.msk.f32.gmra.mrb[18].mxu1 %vm70_vm0, %v475_v10 }
 0x10c   :  { %v349_v17 = vadd.f32 %v2926_v16, %v3640_v52  ;;  %v343_v18 = vpop.f32.mrb[23].mxu0  ;;  %v477_v19 = vsel %vm413_vm6, %v339_v7, %v445_v13 }
 0x10d   :  { %v344_v20 = vadd.f32 %v3640_v52, %v343_v18  ;;  %v476_v21 = vsel %vm412_vm7, %v334_v11, %v444_v15 }
 0x10e   :  { %vm415_vm8 = vcmp.ge.f32.partialorder %v349_v17, 0.0  ;;  %v447_v22 = vmul.f32 0.01, %v349_v17  ;;  %2977 = vmatprep.mubr.msk.f32.mxu1 %vm70_vm0, %v476_v21 }
 0x10f   :  { %vm414_vm9 = vcmp.ge.f32.partialorder %v344_v20, 0.0  ;;  %v446_v23 = vmul.f32 0.01, %v344_v20  ;;  %v2929_v24 = vpop.f32.mrb[24].mxu0  ;;  %2978 = vmatmul.mubr.msk.f32.gmra.mrb[20].mxu1 %vm70_vm0, %v477_v19 }
 0x110   :  { %v359_v25 = vadd.f32 %v2929_v24, %v3640_v52  ;;  %v353_v26 = vpop.f32.mrb[25].mxu0  ;;  %v479_v27 = vsel %vm415_vm8, %v349_v17, %v447_v22 }
 0x111   :  { %v354_v28 = vadd.f32 %v3640_v52, %v353_v26  ;;  %v478_v29 = vsel %vm414_vm9, %v344_v20, %v446_v23 }
 0x112   :  { %vm417_vm10 = vcmp.ge.f32.partialorder %v359_v25, 0.0  ;;  %v449_v30 = vmul.f32 0.01, %v359_v25  ;;  %2980 = vmatprep.mubr.msk.f32.mxu1 %vm70_vm0, %v478_v29 }
 0x113   :  { %vm416_vm11 = vcmp.ge.f32.partialorder %v354_v28, 0.0  ;;  %v448_v31 = vmul.f32 0.01, %v354_v28  ;;  %v2932_v32 = vpop.f32.mrb[26].mxu0  ;;  %2981 = vmatmul.mubr.msk.f32.gmra.mrb[22].mxu1 %vm70_vm0, %v479_v27 }
 0x114   :  { %v369_v33 = vadd.f32 %v2932_v32, %v3640_v52  ;;  %v363_v34 = vpop.f32.mrb[27].mxu0  ;;  %v481_v35 = vsel %vm417_vm10, %v359_v25, %v449_v30 }
 0x115   :  { %v364_v36 = vadd.f32 %v3640_v52, %v363_v34  ;;  %v480_v37 = vsel %vm416_vm11, %v354_v28, %v448_v31 }
 0x116   :  { %vm419_vm12 = vcmp.ge.f32.partialorder %v369_v33, 0.0  ;;  %v451_v38 = vmul.f32 0.01, %v369_v33  ;;  %2983 = vmatprep.mubr.msk.f32.mxu1 %vm70_vm0, %v480_v37 }
 0x117   :  { %vm418_vm13 = vcmp.ge.f32.partialorder %v364_v36, 0.0  ;;  %v450_v39 = vmul.f32 0.01, %v364_v36  ;;  %v2935_v40 = vpop.f32.mrb[28].mxu0  ;;  %2984 = vmatmul.mubr.msk.f32.gmra.mrb[24].mxu1 %vm70_vm0, %v481_v35 }
 0x118   :  { %v379_v41 = vadd.f32 %v2935_v40, %v3640_v52  ;;  %v373_v42 = vpop.f32.mrb[29].mxu0  ;;  %v483_v43 = vsel %vm419_vm12, %v369_v33, %v451_v38 }
 0x119   :  { %v374_v44 = vadd.f32 %v3640_v52, %v373_v42  ;;  %v482_v45 = vsel %vm418_vm13, %v364_v36, %v450_v39 }
 0x11a   :  { %vm421_vm14 = vcmp.ge.f32.partialorder %v379_v41, 0.0  ;;  %v453_v46 = vmul.f32 0.01, %v379_v41  ;;  %2986 = vmatprep.mubr.msk.f32.mxu1 %vm70_vm0, %v482_v45 }
 0x11b   :  { %vm420_vm15 = vcmp.ge.f32.partialorder %v374_v44, 0.0  ;;  %v452_v47 = vmul.f32 0.01, %v374_v44  ;;  %v2938_v48 = vpop.f32.mrb[30].mxu0  ;;  %2987 = vmatmul.mubr.msk.f32.gmra.mrb[26].mxu1 %vm70_vm0, %v483_v43 }
 0x11c   :  { %v389_v49 = vadd.f32 %v2938_v48, %v3640_v52  ;;  %v383_v50 = vpop.f32.mrb[31].mxu0  ;;  %v485_v51 = vsel %vm421_vm14, %v379_v41, %v453_v46 }
 0x11d   :  { %v384_v53 = vadd.f32 %v3640_v52, %v383_v50  ;;  %v484_v54 = vsel %vm420_vm15, %v374_v44, %v452_v47 }
 0x11e   :  { %vm423_vm1 = vcmp.ge.f32.partialorder %v389_v49, 0.0  ;;  %v455_v56 = vmul.f32 0.01, %v389_v49  ;;  %2989 = vmatprep.mubr.msk.f32.mxu1 %vm70_vm0, %v484_v54 }
 0x11f   :  { %vm422_vm2 = vcmp.ge.f32.partialorder %v384_v53, 0.0  ;;  %v454_v57 = vmul.f32 0.01, %v384_v53  ;;  %2990 = vmatmul.mubr.msk.f32.gmra.mrb[28].mxu1 %vm70_vm0, %v485_v51  ;;  %v3005_v58 = vpop.f32.mrb[32].mxu0 }
 0x120   :  { %v935_v59 = vpop.f32.mrb[33].mxu0  ;;  %v487_v60 = vsel %vm423_vm1, %v389_v49, %v455_v56  ;;  %v986_v61 = vadd.f32 %v3005_v58, %v3706_v55 }
 0x121   :  { %v985_v62 = vadd.f32 %v3706_v55, %v935_v59  ;;  %v486_v63 = vsel %vm422_vm2, %v384_v53, %v454_v57 }
 0x122   :  { %2992 = vmatprep.mubr.msk.f32.mxu1 %vm70_vm0, %v486_v63  ;;  %995 = vrot.lane.b32.xlu1 %v986_v61, %s3410_s1 }
 0x123   :  { %2993 = vmatmul.mubr.msk.f32.gmra.mrb[30].mxu1 %vm70_vm0, %v487_v60  ;;  %993 = vrot.lane.b32.xlu0 %v985_v62, %s3410_s1  ;;  %v3008_v52 = vpop.f32.mrb[34].mxu0 }
 0x124   :  { %v988_v0 = vadd.f32 %v3008_v52, %v3706_v55  ;;  %v945_v1 = vpop.f32.mrb[35].mxu0 }
 0x125   :  { %v987_v2 = vadd.f32 %v3706_v55, %v945_v1 }
 0x127   :  { %999 = vrot.lane.b32.xlu0 %v988_v0, %s3410_s1  ;;  %997 = vrot.lane.b32.xlu1 %v987_v2, %s3410_s1 }
 0x194   :  { %v996_v53 = vpop.permute.xlu1 %995 }
 0x195   :  { %v994_v50 = vpop.permute.xlu0 %993 }
 0x1ba   :  { %v2949_v4 = vpop.f32.mrb[0].mxu1 }
 0x1bb   :  { %v3726_v5 = vadd.f32 %v2949_v4, %v3723_v3  ;;  %v661_v6 = vpop.f32.mrb[1].mxu1 }
 0x1bc   :  { %v3729_v7 = vadd.f32 %v3723_v3, %v661_v6 }
 0x1bd   :  { %v955_v8 = vadd.f32 %v3005_v58, %v3726_v5 }
 0x1be   :  { %v954_v10 = vadd.f32 %v935_v59, %v3729_v7  ;;  %v2952_v11 = vpop.f32.mrb[2].mxu1 }
 0x1bf   :  { %v2688_v12 = vmul.f32 -1.442695, %v955_v8  ;;  %v3734_v13 = vadd.f32 %v2952_v11, %v3723_v3  ;;  %v671_v15 = vpop.f32.mrb[3].mxu1  ;;  %v998_v8 = vpop.permute.xlu1 %997 }
 0x1c0   :  { %v2687_v16 = vmul.f32 -1.442695, %v954_v10  ;;  %v3737_v17 = vadd.f32 %v3723_v3, %v671_v15 }
 0x1c1   :  { %3193 = vpow2.f32 %v2688_v12  ;;  %v957_v18 = vadd.f32 %v3008_v52, %v3734_v13 }
 0x1c2   :  { %3195 = vpow2.f32 %v2687_v16  ;;  %v956_v19 = vadd.f32 %v945_v1, %v3737_v17  ;;  %v2955_v20 = vpop.f32.mrb[4].mxu1  ;;  %v1000_v1 = vpop.permute.xlu0 %999 }
 0x1c3   :  { %v2690_v21 = vmul.f32 -1.442695, %v957_v18  ;;  %v3742_v22 = vadd.f32 %v2955_v20, %v3723_v3  ;;  %v681_v23 = vpop.f32.mrb[5].mxu1 }
 0x1c4   :  { %v2689_v24 = vmul.f32 -1.442695, %v956_v19  ;;  %v3745_v25 = vadd.f32 %v3723_v3, %v681_v23 }
 0x1c5   :  { %3197 = vpow2.f32 %v2690_v21 }
 0x1c6   :  { %3199 = vpow2.f32 %v2689_v24  ;;  %v2958_v26 = vpop.f32.mrb[6].mxu1 }
 0x1c7   :  { %v3748_v27 = vadd.f32 %v2958_v26, %v3723_v3  ;;  %v691_v28 = vpop.f32.mrb[7].mxu1 }
 0x1c8   :  { %v3751_v29 = vadd.f32 %v3723_v3, %v691_v28 }
 0x1ca   :  { %v2961_v30 = vpop.f32.mrb[8].mxu1 }
 0x1cb   :  { %v3194_v31 = vpop.eup %3193  ;;  %v3754_v32 = vadd.f32 %v2961_v30, %v3723_v3  ;;  %v701_v33 = vpop.f32.mrb[9].mxu1 }
 0x1cc   :  { %v3196_v34 = vpop.eup %3195  ;;  %v971_v35 = vadd.f32 1.0, %v3194_v31  ;;  %v3757_v36 = vadd.f32 %v3723_v3, %v701_v33 }
 0x1cd   :  { %v970_v37 = vadd.f32 1.0, %v3196_v34 }
 0x1ce   :  { %3201 = vrcp.f32 %v971_v35  ;;  %v2964_v38 = vpop.f32.mrb[10].mxu1 }
 0x1cf   :  { %v3198_v39 = vpop.eup %3197  ;;  %3203 = vrcp.f32 %v970_v37  ;;  %v3760_v40 = vadd.f32 %v2964_v38, %v3723_v3  ;;  %v711_v41 = vpop.f32.mrb[11].mxu1 }
 0x1d0   :  { %v3200_v42 = vpop.eup %3199  ;;  %v973_v43 = vadd.f32 1.0, %v3198_v39  ;;  %v3763_v44 = vadd.f32 %v3723_v3, %v711_v41 }
 0x1d1   :  { %v972_v45 = vadd.f32 1.0, %v3200_v42 }
 0x1d2   :  { %3205 = vrcp.f32 %v973_v43  ;;  %v2967_v46 = vpop.f32.mrb[12].mxu1 }
 0x1d3   :  { %3207 = vrcp.f32 %v972_v45  ;;  %v3766_v47 = vadd.f32 %v2967_v46, %v3723_v3  ;;  %v721_v48 = vpop.f32.mrb[13].mxu1 }
 0x1d4   :  { %v3769_v49 = vadd.f32 %v3723_v3, %v721_v48 }
 0x1d6   :  { %v2970_v51 = vpop.f32.mrb[14].mxu1 }
 0x1d7   :  { %v3772_v54 = vadd.f32 %v2970_v51, %v3723_v3  ;;  %v731_v56 = vpop.f32.mrb[15].mxu1 }
 0x1d8   :  { %v3774_v57 = vpop.eup %3201  ;;  %v3777_v58 = vadd.f32 %v3723_v3, %v731_v56 }
 0x1d9   :  { %v3779_v59 = vpop.eup %3203  ;;  %v1006_v60 = vmul.f32 %v3774_v57, %v996_v53 }
 0x1da   :  { %v1005_v61 = vmul.f32 %v3779_v59, %v994_v50  ;;  %v2973_v62 = vpop.f32.mrb[16].mxu1 }
 0x1db   :  { %1015 = vrot.lane.b32.xlu0 %v1006_v60, %s3410_s1  ;;  %v3785_v63 = vadd.f32 %v2973_v62, %v3723_v3  ;;  %v741_v52 = vpop.f32.mrb[17].mxu1 }
 0x1dc   :  { %v3787_v0 = vpop.eup %3205  ;;  %1013 = vrot.lane.b32.xlu1 %v1005_v61, %s3410_s1  ;;  %v3791_v2 = vadd.f32 %v3723_v3, %v741_v52 }
 0x1dd   :  { %v3793_v4 = vpop.eup %3207  ;;  %v1008_v6 = vmul.f32 %v3787_v0, %v1000_v1 }
 0x1de   :  { %v1007_v10 = vmul.f32 %v3793_v4, %v998_v8  ;;  %v2976_v11 = vpop.f32.mrb[18].mxu1 }
 0x1df   :  { %1019 = vrot.lane.b32.xlu0 %v1008_v6, %s3410_s1  ;;  %v3799_v12 = vadd.f32 %v2976_v11, %v3723_v3  ;;  %v751_v15 = vpop.f32.mrb[19].mxu1  ;;  %v1058_v11 = vmul.f32 0.0, %v3774_v57 }
 0x1e0   :  { %1017 = vrot.lane.b32.xlu1 %v1007_v10, %s3410_s1  ;;  %v3803_v16 = vadd.f32 %v3723_v3, %v751_v15 }
 0x1e2   :  { %v2979_v18 = vpop.f32.mrb[20].mxu1 }
 0x1e3   :  { %v3806_v19 = vadd.f32 %v2979_v18, %v3723_v3  ;;  %v761_v20 = vpop.f32.mrb[21].mxu1 }
 0x1e4   :  { %v3809_v21 = vadd.f32 %v3723_v3, %v761_v20  ;;  %v1057_v20 = vmul.f32 0.0, %v3779_v59 }
 0x1e6   :  { %v2982_v23 = vpop.f32.mrb[22].mxu1 }
 0x1e7   :  { %v3812_v24 = vadd.f32 %v2982_v23, %v3723_v3  ;;  %v771_v26 = vpop.f32.mrb[23].mxu1 }
 0x1e8   :  { %v3815_v28 = vadd.f32 %v3723_v3, %v771_v26 }
 0x1ea   :  { %v2985_v30 = vpop.f32.mrb[24].mxu1 }
 0x1eb   :  { %v3818_v31 = vadd.f32 %v2985_v30, %v3723_v3  ;;  %v781_v33 = vpop.f32.mrb[25].mxu1  ;;  %v1036_v30 = vsub.f32 1.0, %v3787_v0 }
 0x1ec   :  { %v3821_v34 = vadd.f32 %v3723_v3, %v781_v33 }
 0x1ee   :  { %v2988_v35 = vpop.f32.mrb[26].mxu1 }
 0x1ef   :  { %v3824_v37 = vadd.f32 %v2988_v35, %v3723_v3  ;;  %v791_v38 = vpop.f32.mrb[27].mxu1 }
 0x1f0   :  { %v3827_v39 = vadd.f32 %v3723_v3, %v791_v38  ;;  %v1035_v38 = vsub.f32 1.0, %v3793_v4 }
 0x1f2   :  { %v2991_v41 = vpop.f32.mrb[28].mxu1 }
 0x1f3   :  { %v3830_v42 = vadd.f32 %v2991_v41, %v3723_v3  ;;  %v801_v43 = vpop.f32.mrb[29].mxu1  ;;  %v1060_v41 = vmul.f32 0.0, %v3787_v0 }
 0x1f4   :  { %v3833_v45 = vadd.f32 %v3723_v3, %v801_v43 }
 0x1f6   :  { %v2994_v46 = vpop.f32.mrb[30].mxu1 }
 0x1f7   :  { %v3836_v48 = vadd.f32 %v2994_v46, %v3723_v3  ;;  %v811_v50 = vpop.f32.mrb[31].mxu1  ;;  %v1059_v46 = vmul.f32 0.0, %v3793_v4 }
 0x1f8   :  { %v3839_v51 = vadd.f32 %v3723_v3, %v811_v50 }
 0x24d   :  { %v1016_v53 = vpop.permute.xlu0 %1015 }
 0x24e   :  { %v1026_v56 = vadd.f32 %v1016_v53, %v3726_v5  ;;  %v1014_v60 = vpop.permute.xlu1 %1013 }
 0x24f   :  { %v1025_v61 = vadd.f32 %v1014_v60, %v3729_v7  ;;  %v1034_v7 = vsub.f32 1.0, %v3774_v57 }
 0x250   :  { %3209 = vtanh.f32 %v1026_v56 }
 0x251   :  { %3211 = vtanh.f32 %v1025_v61  ;;  %v1020_v62 = vpop.permute.xlu0 %1019 }
 0x252   :  { %v1028_v52 = vadd.f32 %v1020_v62, %v3734_v13  ;;  %v1018_v1 = vpop.permute.xlu1 %1017 }
 0x253   :  { %v1027_v6 = vadd.f32 %v1018_v1, %v3737_v17  ;;  %v1033_v17 = vsub.f32 1.0, %v3779_v59 }
 0x254   :  { %3213 = vtanh.f32 %v1028_v52 }
 0x255   :  { %3215 = vtanh.f32 %v1027_v6 }
 0x25a   :  { %v3210_v8 = vpop.eup %3209 }
 0x25b   :  { %v3212_v10 = vpop.eup %3211  ;;  %1043 = vrot.lane.b32.xlu0 %v3210_v8, %s3411_s4 }
 0x25c   :  { %1041 = vrot.lane.b32.xlu1 %v3212_v10, %s3411_s4 }
 0x25e   :  { %v3214_v3 = vpop.eup %3213 }
 0x25f   :  { %v3216_v5 = vpop.eup %3215  ;;  %1047 = vrot.lane.b32.xlu0 %v3214_v3, %s3411_s4 }
 0x260   :  { %1045 = vrot.lane.b32.xlu1 %v3216_v5, %s3411_s4 }
 0x2cd   :  { %v1044_v13 = vpop.permute.xlu0 %1043 }
 0x2ce   :  { %v1054_v15 = vmul.f32 %v1044_v13, %v1034_v7  ;;  %v1042_v18 = vpop.permute.xlu1 %1041 }
 0x2cf   :  { %v1053_v23 = vmul.f32 %v1042_v18, %v1033_v17 }
 0x2d0   :  { %v3853_v26 = vadd.f32 %v1058_v11, %v1054_v15 }
 0x2d1   :  { %v3856_v33 = vadd.f32 %v1057_v20, %v1053_v23  ;;  %v1048_v35 = vpop.permute.xlu0 %1047 }
 0x2d2   :  { %v1056_v43 = vmul.f32 %v1048_v35, %v1036_v30  ;;  %1075 = vrot.lane.b32.xlu0 %v3853_v26, %s3411_s4  ;;  %v1046_v57 = vpop.permute.xlu1 %1045 }
 0x2d3   :  { %v1055_v59 = vmul.f32 %v1046_v57, %v1035_v38  ;;  %1073 = vrot.lane.b32.xlu1 %v3856_v33, %s3411_s4 }
 0x2d4   :  { %v3865_v50 = vadd.f32 %v1060_v41, %v1056_v43 }
 0x2d5   :  { %v3867_v53 = vadd.f32 %v1059_v46, %v1055_v59 }
 0x2d6   :  { %1079 = vrot.lane.b32.xlu0 %v3865_v50, %s3411_s4 }
 0x2d7   :  { %1077 = vrot.lane.b32.xlu1 %v3867_v53, %s3411_s4 }
 0x344   :  { %v1076_v0 = vpop.permute.xlu0 %1075 }
 0x345   :  { %v1074_v56 = vpop.permute.xlu1 %1073 }
 0x346   :  { %3017 = vmatprep.mubr.msk.f32.mxu1 %vm70_vm0, %v1074_v56 }
 0x347   :  { %3018 = vmatmul.mubr.msk.f32.vlgmr.msra.gmra.mrb[32].mxu1 %vm70_vm0, %v1076_v0 }
 0x348   :  { %3150 = vmatpush3.bf16.msra.mxu1 %v3477_v9  ;;  %v1080_v60 = vpop.permute.xlu0 %1079 }
 0x349   :  { %v1078_v4 = vpop.permute.xlu1 %1077  ;;  %3152 = vmatprep.subr.bf16.mxu1 %v3492_v14 }
 0x34a   :  { %3020 = vmatprep.mubr.msk.f32.mxu1 %vm70_vm0, %v1078_v4 }
 0x34b   :  { %3021 = vmatmul.mubr.msk.f32.gmra.mrb[34].mxu1 %vm70_vm0, %v1080_v60 }
 0x34c   :  { %3154 = vmatpush3.bf16.msra.mxu1 %v3492_v14 }
 0x34d   :  { %3164 = vmatprep.subr.bf16.mxu1 %v3477_v9 }
 0x41a   :  { %v3019_v61 = vpop.f32.mrb[32].mxu1 }
 0x41b   :  { %v1203_v62 = vadd.f32 %v3019_v61, %v3706_v55  ;;  %v1155_v52 = vpop.f32.mrb[33].mxu1  ;;  %v1175_v5 = vadd.f32 %v3019_v61, %v3742_v22 }
 0x41c   :  { %v1202_v1 = vadd.f32 %v1155_v52, %v3706_v55  ;;  %v1174_v7 = vadd.f32 %v1155_v52, %v3745_v25 }
 0x41d   :  { %1212 = vrot.lane.b32.xlu0 %v1203_v62, %s3410_s1  ;;  %v2696_v13 = vmul.f32 -1.442695, %v1175_v5 }
 0x41e   :  { %1210 = vrot.lane.b32.xlu1 %v1202_v1, %s3410_s1  ;;  %v3022_v6 = vpop.f32.mrb[34].mxu1  ;;  %v2695_v11 = vmul.f32 -1.442695, %v1174_v7 }
 0x41f   :  { %v1205_v8 = vadd.f32 %v3022_v6, %v3706_v55  ;;  %v1165_v10 = vpop.f32.mrb[35].mxu1  ;;  %v1177_v17 = vadd.f32 %v3022_v6, %v3748_v27  ;;  %3217 = vpow2.f32 %v2696_v13 }
 0x420   :  { %v1204_v3 = vadd.f32 %v1165_v10, %v3706_v55  ;;  %v1176_v15 = vadd.f32 %v1165_v10, %v3751_v29  ;;  %3219 = vpow2.f32 %v2695_v11 }
 0x421   :  { %1216 = vrot.lane.b32.xlu0 %v1205_v8, %s3410_s1  ;;  %v2698_v18 = vmul.f32 -1.442695, %v1177_v17 }
 0x422   :  { %1214 = vrot.lane.b32.xlu1 %v1204_v3, %s3410_s1  ;;  %v2697_v20 = vmul.f32 -1.442695, %v1176_v15 }
 0x423   :  { %3221 = vpow2.f32 %v2698_v18 }
 0x424   :  { %3223 = vpow2.f32 %v2697_v20 }
 0x429   :  { %v3218_v23 = vpop.eup %3217 }
 0x42a   :  { %v3220_v30 = vpop.eup %3219  ;;  %v1191_v35 = vadd.f32 1.0, %v3218_v23 }
 0x42b   :  { %v1190_v41 = vadd.f32 1.0, %v3220_v30 }
 0x42c   :  { %3225 = vrcp.f32 %v1191_v35 }
 0x42d   :  { %v3222_v38 = vpop.eup %3221  ;;  %3227 = vrcp.f32 %v1190_v41 }
 0x42e   :  { %v3224_v43 = vpop.eup %3223  ;;  %v1193_v57 = vadd.f32 1.0, %v3222_v38 }
 0x42f   :  { %v1192_v46 = vadd.f32 1.0, %v3224_v43 }
 0x430   :  { %3229 = vrcp.f32 %v1193_v57 }
 0x431   :  { %3231 = vrcp.f32 %v1192_v46 }
 0x436   :  { %v3226_v59 = vpop.eup %3225 }
 0x437   :  { %v3228_v56 = vpop.eup %3227  ;;  %v1275_v38 = vmul.f32 %v3226_v59, %v3853_v26 }
 0x438   :  { %v1274_v43 = vmul.f32 %v3228_v56, %v3856_v33 }
 0x43a   :  { %v3230_v62 = vpop.eup %3229 }
 0x43b   :  { %v3232_v1 = vpop.eup %3231 }
 0x43c   :  { %v1276_v26 = vmul.f32 %v3232_v1, %v3867_v53 }
 0x48f   :  { %v1213_v0 = vpop.permute.xlu0 %1212 }
 0x490   :  { %v1223_v4 = vmul.f32 %v3226_v59, %v1213_v0  ;;  %v1211_v60 = vpop.permute.xlu1 %1210  ;;  %v1253_v0 = vsub.f32 1.0, %v3230_v62 }
 0x491   :  { %v1222_v61 = vmul.f32 %v3228_v56, %v1211_v60 }
 0x492   :  { %1232 = vrot.lane.b32.xlu0 %v1223_v4, %s3410_s1 }
 0x493   :  { %v1217_v52 = vpop.permute.xlu0 %1216  ;;  %1230 = vrot.lane.b32.xlu1 %v1222_v61, %s3410_s1  ;;  %v1252_v61 = vsub.f32 1.0, %v3232_v1 }
 0x494   :  { %v1225_v6 = vmul.f32 %v3230_v62, %v1217_v52  ;;  %v1215_v8 = vpop.permute.xlu1 %1214  ;;  %v1277_v52 = vmul.f32 %v3230_v62, %v3865_v50 }
 0x495   :  { %v1224_v10 = vmul.f32 %v3232_v1, %v1215_v8 }
 0x496   :  { %1236 = vrot.lane.b32.xlu0 %v1225_v6, %s3410_s1 }
 0x497   :  { %1234 = vrot.lane.b32.xlu1 %v1224_v10, %s3410_s1 }
 0x504   :  { %v1233_v3 = vpop.permute.xlu0 %1232 }
 0x505   :  { %v1243_v5 = vadd.f32 %v1233_v3, %v3742_v22  ;;  %v1231_v7 = vpop.permute.xlu1 %1230 }
 0x506   :  { %v1242_v13 = vadd.f32 %v1231_v7, %v3745_v25  ;;  %v1251_v25 = vsub.f32 1.0, %v3226_v59 }
 0x507   :  { %3233 = vtanh.f32 %v1243_v5 }
 0x508   :  { %3235 = vtanh.f32 %v1242_v13  ;;  %v1237_v17 = vpop.permute.xlu0 %1236 }
 0x509   :  { %v1245_v11 = vadd.f32 %v1237_v17, %v3748_v27  ;;  %v1235_v15 = vpop.permute.xlu1 %1234  ;;  %v1250_v27 = vsub.f32 1.0, %v3228_v56 }
 0x50a   :  { %v1244_v18 = vadd.f32 %v1235_v15, %v3751_v29 }
 0x50b   :  { %3237 = vtanh.f32 %v1245_v11 }
 0x50c   :  { %3239 = vtanh.f32 %v1244_v18 }
 0x511   :  { %v3234_v20 = vpop.eup %3233 }
 0x512   :  { %v3236_v23 = vpop.eup %3235  ;;  %1260 = vrot.lane.b32.xlu0 %v3234_v20, %s3411_s4 }
 0x513   :  { %1258 = vrot.lane.b32.xlu1 %v3236_v23, %s3411_s4 }
 0x515   :  { %v3238_v22 = vpop.eup %3237 }
 0x516   :  { %v3240_v30 = vpop.eup %3239  ;;  %1264 = vrot.lane.b32.xlu0 %v3238_v22, %s3411_s4 }
 0x517   :  { %1262 = vrot.lane.b32.xlu1 %v3240_v30, %s3411_s4 }
 0x584   :  { %v1261_v35 = vpop.permute.xlu0 %1260 }
 0x585   :  { %v1271_v29 = vmul.f32 %v1261_v35, %v1251_v25  ;;  %v1259_v41 = vpop.permute.xlu1 %1258 }
 0x586   :  { %v1270_v57 = vmul.f32 %v1259_v41, %v1250_v27 }
 0x587   :  { %v3907_v46 = vadd.f32 %v1275_v38, %v1271_v29 }
 0x588   :  { %v3909_v4 = vadd.f32 %v1274_v43, %v1270_v57  ;;  %v1265_v60 = vpop.permute.xlu0 %1264 }
 0x589   :  { %v1273_v6 = vmul.f32 %v1265_v60, %v1253_v0  ;;  %1292 = vrot.lane.b32.xlu0 %v3907_v46, %s3411_s4  ;;  %v1263_v8 = vpop.permute.xlu1 %1262 }
 0x58a   :  { %v1272_v59 = vmul.f32 %v1263_v8, %v1252_v61  ;;  %1290 = vrot.lane.b32.xlu1 %v3909_v4, %s3411_s4 }
 0x58b   :  { %v3917_v33 = vadd.f32 %v1277_v52, %v1273_v6 }
 0x58c   :  { %v3919_v56 = vadd.f32 %v1276_v26, %v1272_v59 }
 0x58d   :  { %1296 = vrot.lane.b32.xlu0 %v3917_v33, %s3411_s4 }
 0x58e   :  { %1294 = vrot.lane.b32.xlu1 %v3919_v56, %s3411_s4 }
 0x5fb   :  { %v1293_v50 = vpop.permute.xlu0 %1292 }
 0x5fc   :  { %v1291_v62 = vpop.permute.xlu1 %1290 }
 0x5fd   :  { %3031 = vmatprep.mubr.msk.f32.mxu0 %vm70_vm0, %v1291_v62 }
 0x5fe   :  { %3032 = vmatmul.mubr.msk.f32.vlgmr.msra.gmra.mrb[36].mxu0 %vm70_vm0, %v1293_v50 }
 0x5ff   :  { %3158 = vmatpush3.bf16.msra.mxu0 %v3477_v9  ;;  %v1297_v1 = vpop.permute.xlu0 %1296 }
 0x600   :  { %v1295_v53 = vpop.permute.xlu1 %1294  ;;  %3160 = vmatprep.subr.bf16.mxu0 %v3492_v14 }
 0x601   :  { %3034 = vmatprep.mubr.msk.f32.mxu0 %vm70_vm0, %v1295_v53 }
 0x602   :  { %3035 = vmatmul.mubr.msk.f32.gmra.mrb[38].mxu0 %vm70_vm0, %v1297_v1 }
 0x603   :  { %3162 = vmatpush3.bf16.msra.mxu0 %v3492_v14 }
 0x604   :  { %3172 = vmatprep.subr.bf16.mxu0 %v3477_v9 }
 0x6d1   :  { %v3033_v10 = vpop.f32.mrb[36].mxu0 }
 0x6d2   :  { %v1420_v3 = vadd.f32 %v3033_v10, %v3706_v55  ;;  %v1372_v5 = vpop.f32.mrb[37].mxu0  ;;  %v1392_v18 = vadd.f32 %v3033_v10, %v3754_v32 }
 0x6d3   :  { %v1419_v7 = vadd.f32 %v1372_v5, %v3706_v55  ;;  %v1391_v20 = vadd.f32 %v1372_v5, %v3757_v36 }
 0x6d4   :  { %1429 = vrot.lane.b32.xlu0 %v1420_v3, %s3410_s1  ;;  %v2704_v23 = vmul.f32 -1.442695, %v1392_v18 }
 0x6d5   :  { %1427 = vrot.lane.b32.xlu1 %v1419_v7, %s3410_s1  ;;  %v3036_v13 = vpop.f32.mrb[38].mxu0  ;;  %v2703_v30 = vmul.f32 -1.442695, %v1391_v20 }
 0x6d6   :  { %v1422_v17 = vadd.f32 %v3036_v13, %v3706_v55  ;;  %v1382_v11 = vpop.f32.mrb[39].mxu0  ;;  %v1394_v22 = vadd.f32 %v3036_v13, %v3760_v40  ;;  %3241 = vpow2.f32 %v2704_v23 }
 0x6d7   :  { %v1421_v15 = vadd.f32 %v1382_v11, %v3706_v55  ;;  %v1393_v25 = vadd.f32 %v1382_v11, %v3763_v44  ;;  %3243 = vpow2.f32 %v2703_v30 }
 0x6d8   :  { %1433 = vrot.lane.b32.xlu0 %v1422_v17, %s3410_s1  ;;  %v2706_v35 = vmul.f32 -1.442695, %v1394_v22 }
 0x6d9   :  { %1431 = vrot.lane.b32.xlu1 %v1421_v15, %s3410_s1  ;;  %v2705_v27 = vmul.f32 -1.442695, %v1393_v25 }
 0x6da   :  { %3245 = vpow2.f32 %v2706_v35 }
 0x6db   :  { %3247 = vpow2.f32 %v2705_v27 }
 0x6e0   :  { %v3242_v38 = vpop.eup %3241 }
 0x6e1   :  { %v3244_v29 = vpop.eup %3243  ;;  %v1408_v41 = vadd.f32 1.0, %v3242_v38 }
 0x6e2   :  { %v1407_v57 = vadd.f32 1.0, %v3244_v29 }
 0x6e3   :  { %3249 = vrcp.f32 %v1408_v41 }
 0x6e4   :  { %v3246_v43 = vpop.eup %3245  ;;  %3251 = vrcp.f32 %v1407_v57 }
 0x6e5   :  { %v3248_v0 = vpop.eup %3247  ;;  %v1410_v60 = vadd.f32 1.0, %v3246_v43 }
 0x6e6   :  { %v1409_v61 = vadd.f32 1.0, %v3248_v0 }
 0x6e7   :  { %3253 = vrcp.f32 %v1410_v60 }
 0x6e8   :  { %3255 = vrcp.f32 %v1409_v61 }
 0x6ed   :  { %v3250_v52 = vpop.eup %3249 }
 0x6ee   :  { %v3252_v8 = vpop.eup %3251  ;;  %v1492_v27 = vmul.f32 %v3250_v52, %v3907_v46 }
 0x6ef   :  { %v1491_v29 = vmul.f32 %v3252_v8, %v3909_v4 }
 0x6f1   :  { %v3254_v62 = vpop.eup %3253 }
 0x6f2   :  { %v3256_v1 = vpop.eup %3255  ;;  %v1470_v57 = vsub.f32 1.0, %v3254_v62 }
 0x6f3   :  { %v1469_v61 = vsub.f32 1.0, %v3256_v1  ;;  %v1493_v46 = vmul.f32 %v3256_v1, %v3919_v56 }
 0x746   :  { %v1430_v6 = vpop.permute.xlu0 %1429 }
 0x747   :  { %v1440_v26 = vmul.f32 %v3250_v52, %v1430_v6  ;;  %v1428_v59 = vpop.permute.xlu1 %1427  ;;  %v1494_v6 = vmul.f32 %v3254_v62, %v3917_v33 }
 0x748   :  { %v1439_v50 = vmul.f32 %v3252_v8, %v1428_v59 }
 0x749   :  { %1449 = vrot.lane.b32.xlu0 %v1440_v26, %s3410_s1 }
 0x74a   :  { %v1434_v53 = vpop.permute.xlu0 %1433  ;;  %1447 = vrot.lane.b32.xlu1 %v1439_v50, %s3410_s1 }
 0x74b   :  { %v1442_v10 = vmul.f32 %v3254_v62, %v1434_v53  ;;  %v1432_v3 = vpop.permute.xlu1 %1431 }
 0x74c   :  { %v1441_v5 = vmul.f32 %v3256_v1, %v1432_v3 }
 0x74d   :  { %1453 = vrot.lane.b32.xlu0 %v1442_v10, %s3410_s1 }
 0x74e   :  { %1451 = vrot.lane.b32.xlu1 %v1441_v5, %s3410_s1 }
 0x7bb   :  { %v1450_v7 = vpop.permute.xlu0 %1449 }
 0x7bc   :  { %v1460_v13 = vadd.f32 %v1450_v7, %v3754_v32  ;;  %v1448_v17 = vpop.permute.xlu1 %1447 }
 0x7bd   :  { %v1459_v11 = vadd.f32 %v1448_v17, %v3757_v36  ;;  %v1468_v36 = vsub.f32 1.0, %v3250_v52 }
 0x7be   :  { %3257 = vtanh.f32 %v1460_v13 }
 0x7bf   :  { %3259 = vtanh.f32 %v1459_v11  ;;  %v1454_v15 = vpop.permute.xlu0 %1453 }
 0x7c0   :  { %v1462_v18 = vadd.f32 %v1454_v15, %v3760_v40  ;;  %v1452_v20 = vpop.permute.xlu1 %1451  ;;  %v1467_v40 = vsub.f32 1.0, %v3252_v8 }
 0x7c1   :  { %v1461_v23 = vadd.f32 %v1452_v20, %v3763_v44 }
 0x7c2   :  { %3261 = vtanh.f32 %v1462_v18 }
 0x7c3   :  { %3263 = vtanh.f32 %v1461_v23 }
 0x7c8   :  { %v3258_v22 = vpop.eup %3257 }
 0x7c9   :  { %v3260_v30 = vpop.eup %3259  ;;  %1477 = vrot.lane.b32.xlu0 %v3258_v22, %s3411_s4 }
 0x7ca   :  { %1475 = vrot.lane.b32.xlu1 %v3260_v30, %s3411_s4 }
 0x7cc   :  { %v3262_v32 = vpop.eup %3261 }
 0x7cd   :  { %v3264_v25 = vpop.eup %3263  ;;  %1481 = vrot.lane.b32.xlu0 %v3262_v32, %s3411_s4 }
 0x7ce   :  { %1479 = vrot.lane.b32.xlu1 %v3264_v25, %s3411_s4 }
 0x83b   :  { %v1478_v35 = vpop.permute.xlu0 %1477 }
 0x83c   :  { %v1488_v44 = vmul.f32 %v1478_v35, %v1468_v36  ;;  %v1476_v38 = vpop.permute.xlu1 %1475 }
 0x83d   :  { %v1487_v41 = vmul.f32 %v1476_v38, %v1467_v40 }
 0x83e   :  { %v3959_v43 = vadd.f32 %v1492_v27, %v1488_v44 }
 0x83f   :  { %v3961_v0 = vadd.f32 %v1491_v29, %v1487_v41  ;;  %v1482_v60 = vpop.permute.xlu0 %1481 }
 0x840   :  { %v1490_v26 = vmul.f32 %v1482_v60, %v1470_v57  ;;  %1509 = vrot.lane.b32.xlu0 %v3959_v43, %s3411_s4  ;;  %v1480_v59 = vpop.permute.xlu1 %1479 }
 0x841   :  { %v1489_v52 = vmul.f32 %v1480_v59, %v1469_v61  ;;  %1507 = vrot.lane.b32.xlu1 %v3961_v0, %s3411_s4 }
 0x842   :  { %v3969_v4 = vadd.f32 %v1494_v6, %v1490_v26 }
 0x843   :  { %v3971_v8 = vadd.f32 %v1493_v46, %v1489_v52 }
 0x844   :  { %1513 = vrot.lane.b32.xlu0 %v3969_v4, %s3411_s4 }
 0x845   :  { %1511 = vrot.lane.b32.xlu1 %v3971_v8, %s3411_s4 }
 0x8b2   :  { %v1510_v33 = vpop.permute.xlu0 %1509 }
 0x8b3   :  { %v1508_v50 = vpop.permute.xlu1 %1507 }
 0x8b4   :  { %3045 = vmatprep.mubr.msk.f32.mxu1 %vm70_vm0, %v1508_v50 }
 0x8b5   :  { %3046 = vmatmul.mubr.msk.f32.vlgmr.msra.gmra.mrb[36].mxu1 %vm70_vm0, %v1510_v33 }
 0x8b6   :  { %3166 = vmatpush3.bf16.msra.mxu1 %v3477_v9  ;;  %v1514_v62 = vpop.permute.xlu0 %1513 }
 0x8b7   :  { %v1512_v56 = vpop.permute.xlu1 %1511  ;;  %3168 = vmatprep.subr.bf16.mxu1 %v3492_v14 }
 0x8b8   :  { %3048 = vmatprep.mubr.msk.f32.mxu1 %vm70_vm0, %v1512_v56 }
 0x8b9   :  { %3049 = vmatmul.mubr.msk.f32.gmra.mrb[38].mxu1 %vm70_vm0, %v1514_v62 }
 0x8ba   :  { %3170 = vmatpush3.bf16.msra.mxu1 %v3492_v14 }
 0x8bb   :  { %3180 = vmatprep.subr.bf16.mxu1 %v3477_v9 }
 0x988   :  { %v3047_v53 = vpop.f32.mrb[36].mxu1 }
 0x989   :  { %v1637_v1 = vadd.f32 %v3047_v53, %v3706_v55  ;;  %v1589_v10 = vpop.f32.mrb[37].mxu1  ;;  %v1609_v11 = vadd.f32 %v3047_v53, %v3766_v47 }
 0x98a   :  { %v1636_v3 = vadd.f32 %v1589_v10, %v3706_v55  ;;  %v1608_v15 = vadd.f32 %v1589_v10, %v3769_v49 }
 0x98b   :  { %1646 = vrot.lane.b32.xlu0 %v1637_v1, %s3410_s1  ;;  %v2712_v18 = vmul.f32 -1.442695, %v1609_v11 }
 0x98c   :  { %1644 = vrot.lane.b32.xlu1 %v1636_v3, %s3410_s1  ;;  %v3050_v5 = vpop.f32.mrb[38].mxu1  ;;  %v2711_v23 = vmul.f32 -1.442695, %v1608_v15 }
 0x98d   :  { %v1639_v7 = vadd.f32 %v3050_v5, %v3706_v55  ;;  %v1599_v13 = vpop.f32.mrb[39].mxu1  ;;  %v1611_v20 = vadd.f32 %v3050_v5, %v3772_v54  ;;  %3265 = vpow2.f32 %v2712_v18 }
 0x98e   :  { %v1638_v17 = vadd.f32 %v1599_v13, %v3706_v55  ;;  %v1610_v22 = vadd.f32 %v1599_v13, %v3777_v58  ;;  %3267 = vpow2.f32 %v2711_v23 }
 0x98f   :  { %1650 = vrot.lane.b32.xlu0 %v1639_v7, %s3410_s1  ;;  %v2714_v30 = vmul.f32 -1.442695, %v1611_v20 }
 0x990   :  { %1648 = vrot.lane.b32.xlu1 %v1638_v17, %s3410_s1  ;;  %v2713_v32 = vmul.f32 -1.442695, %v1610_v22 }
 0x991   :  { %3269 = vpow2.f32 %v2714_v30 }
 0x992   :  { %3271 = vpow2.f32 %v2713_v32 }
 0x997   :  { %v3266_v25 = vpop.eup %3265 }
 0x998   :  { %v3268_v36 = vpop.eup %3267  ;;  %v1625_v35 = vadd.f32 1.0, %v3266_v25 }
 0x999   :  { %v1624_v27 = vadd.f32 1.0, %v3268_v36 }
 0x99a   :  { %3273 = vrcp.f32 %v1625_v35 }
 0x99b   :  { %v3270_v40 = vpop.eup %3269  ;;  %3275 = vrcp.f32 %v1624_v27 }
 0x99c   :  { %v3272_v44 = vpop.eup %3271  ;;  %v1627_v38 = vadd.f32 1.0, %v3270_v40 }
 0x99d   :  { %v1626_v29 = vadd.f32 1.0, %v3272_v44 }
 0x99e   :  { %3277 = vrcp.f32 %v1627_v38 }
 0x99f   :  { %3279 = vrcp.f32 %v1626_v29 }
 0x9a4   :  { %v3274_v41 = vpop.eup %3273 }
 0x9a5   :  { %v3276_v60 = vpop.eup %3275  ;;  %v1709_v20 = vmul.f32 %v3274_v41, %v3959_v43 }
 0x9a6   :  { %v1708_v22 = vmul.f32 %v3276_v60, %v3961_v0 }
 0x9a8   :  { %v3278_v59 = vpop.eup %3277 }
 0x9a9   :  { %v3280_v52 = vpop.eup %3279  ;;  %v1687_v25 = vsub.f32 1.0, %v3278_v59  ;;  %v1711_v27 = vmul.f32 %v3278_v59, %v3969_v4 }
 0x9aa   :  { %v1686_v40 = vsub.f32 1.0, %v3280_v52  ;;  %v1710_v43 = vmul.f32 %v3280_v52, %v3971_v8 }
 0x9fd   :  { %v1647_v57 = vpop.permute.xlu0 %1646 }
 0x9fe   :  { %v1657_v61 = vmul.f32 %v3274_v41, %v1647_v57  ;;  %v1645_v6 = vpop.permute.xlu1 %1644 }
 0x9ff   :  { %v1656_v26 = vmul.f32 %v3276_v60, %v1645_v6 }
 0xa00   :  { %1666 = vrot.lane.b32.xlu0 %v1657_v61, %s3410_s1 }
 0xa01   :  { %v1651_v46 = vpop.permute.xlu0 %1650  ;;  %1664 = vrot.lane.b32.xlu1 %v1656_v26, %s3410_s1 }
 0xa02   :  { %v1659_v33 = vmul.f32 %v3278_v59, %v1651_v46  ;;  %v1649_v50 = vpop.permute.xlu1 %1648 }
 0xa03   :  { %v1658_v56 = vmul.f32 %v3280_v52, %v1649_v50 }
 0xa04   :  { %1670 = vrot.lane.b32.xlu0 %v1659_v33, %s3410_s1 }
 0xa05   :  { %1668 = vrot.lane.b32.xlu1 %v1658_v56, %s3410_s1 }
 0xa72   :  { %v1667_v62 = vpop.permute.xlu0 %1666 }
 0xa73   :  { %v1677_v53 = vadd.f32 %v1667_v62, %v3766_v47  ;;  %v1665_v1 = vpop.permute.xlu1 %1664 }
 0xa74   :  { %v1676_v10 = vadd.f32 %v1665_v1, %v3769_v49  ;;  %v1685_v49 = vsub.f32 1.0, %v3274_v41 }
 0xa75   :  { %3281 = vtanh.f32 %v1677_v53 }
 0xa76   :  { %3283 = vtanh.f32 %v1676_v10  ;;  %v1671_v3 = vpop.permute.xlu0 %1670 }
 0xa77   :  { %v1679_v5 = vadd.f32 %v1671_v3, %v3772_v54  ;;  %v1669_v7 = vpop.permute.xlu1 %1668  ;;  %v1684_v54 = vsub.f32 1.0, %v3276_v60 }
 0xa78   :  { %v1678_v13 = vadd.f32 %v1669_v7, %v3777_v58 }
 0xa79   :  { %3285 = vtanh.f32 %v1679_v5 }
 0xa7a   :  { %3287 = vtanh.f32 %v1678_v13 }
 0xa7f   :  { %v3282_v17 = vpop.eup %3281 }
 0xa80   :  { %v3284_v11 = vpop.eup %3283  ;;  %1694 = vrot.lane.b32.xlu0 %v3282_v17, %s3411_s4 }
 0xa81   :  { %1692 = vrot.lane.b32.xlu1 %v3284_v11, %s3411_s4 }
 0xa83   :  { %v3286_v47 = vpop.eup %3285 }
 0xa84   :  { %v3288_v15 = vpop.eup %3287  ;;  %1698 = vrot.lane.b32.xlu0 %v3286_v47, %s3411_s4 }
 0xa85   :  { %1696 = vrot.lane.b32.xlu1 %v3288_v15, %s3411_s4 }
 0xaf2   :  { %v1695_v18 = vpop.permute.xlu0 %1694 }
 0xaf3   :  { %v1705_v58 = vmul.f32 %v1695_v18, %v1685_v49  ;;  %v1693_v23 = vpop.permute.xlu1 %1692 }
 0xaf4   :  { %v1704_v30 = vmul.f32 %v1693_v23, %v1684_v54 }
 0xaf5   :  { %v4011_v32 = vadd.f32 %v1709_v20, %v1705_v58 }
 0xaf6   :  { %v4013_v36 = vadd.f32 %v1708_v22, %v1704_v30  ;;  %v1699_v35 = vpop.permute.xlu0 %1698 }
 0xaf7   :  { %v1707_v44 = vmul.f32 %v1699_v35, %v1687_v25  ;;  %1726 = vrot.lane.b32.xlu0 %v4011_v32, %s3411_s4  ;;  %v1697_v38 = vpop.permute.xlu1 %1696 }
 0xaf8   :  { %v1706_v29 = vmul.f32 %v1697_v38, %v1686_v40  ;;  %1724 = vrot.lane.b32.xlu1 %v4013_v36, %s3411_s4 }
 0xaf9   :  { %v4021_v0 = vadd.f32 %v1711_v27, %v1707_v44 }
 0xafa   :  { %v4023_v41 = vadd.f32 %v1710_v43, %v1706_v29 }
 0xafb   :  { %1730 = vrot.lane.b32.xlu0 %v4021_v0, %s3411_s4 }
 0xafc   :  { %1728 = vrot.lane.b32.xlu1 %v4023_v41, %s3411_s4 }
 0xb69   :  { %v1727_v4 = vpop.permute.xlu0 %1726 }
 0xb6a   :  { %v1725_v57 = vpop.permute.xlu1 %1724 }
 0xb6b   :  { %3059 = vmatprep.mubr.msk.f32.mxu0 %vm70_vm0, %v1725_v57 }
 0xb6c   :  { %3060 = vmatmul.mubr.msk.f32.vlgmr.msra.gmra.mrb[40].mxu0 %vm70_vm0, %v1727_v4 }
 0xb6d   :  { %3174 = vmatpush3.bf16.msra.mxu0 %v3477_v9  ;;  %v1731_v60 = vpop.permute.xlu0 %1730 }
 0xb6e   :  { %v1729_v8 = vpop.permute.xlu1 %1728  ;;  %3176 = vmatprep.subr.bf16.mxu0 %v3492_v14 }
 0xb6f   :  { %3062 = vmatprep.mubr.msk.f32.mxu0 %vm70_vm0, %v1729_v8 }
 0xb70   :  { %3063 = vmatmul.mubr.msk.f32.gmra.mrb[42].mxu0 %vm70_vm0, %v1731_v60 }
 0xb71   :  { %3178 = vmatpush3.bf16.msra.mxu0 %v3492_v14 }
 0xc3f   :  { %v3061_v61 = vpop.f32.mrb[40].mxu0 }
 0xc40   :  { %v1854_v6 = vadd.f32 %v3061_v61, %v3706_v55  ;;  %v1806_v26 = vpop.f32.mrb[41].mxu0  ;;  %v1826_v56 = vadd.f32 %v3061_v61, %v3785_v63 }
 0xc41   :  { %v1853_v59 = vadd.f32 %v1806_v26, %v3706_v55  ;;  %v1825_v62 = vadd.f32 %v1806_v26, %v3791_v2 }
 0xc42   :  { %1863 = vrot.lane.b32.xlu0 %v1854_v6, %s3410_s1  ;;  %v2720_v53 = vmul.f32 -1.442695, %v1826_v56 }
 0xc43   :  { %1861 = vrot.lane.b32.xlu1 %v1853_v59, %s3410_s1  ;;  %v3064_v46 = vpop.f32.mrb[42].mxu0  ;;  %v2719_v10 = vmul.f32 -1.442695, %v1825_v62 }
 0xc44   :  { %v1856_v52 = vadd.f32 %v3064_v46, %v3706_v55  ;;  %v1816_v33 = vpop.f32.mrb[43].mxu0  ;;  %v1828_v1 = vadd.f32 %v3064_v46, %v3799_v12  ;;  %3289 = vpow2.f32 %v2720_v53 }
 0xc45   :  { %v1855_v50 = vadd.f32 %v1816_v33, %v3706_v55  ;;  %v1827_v3 = vadd.f32 %v1816_v33, %v3803_v16  ;;  %3291 = vpow2.f32 %v2719_v10 }
 0xc46   :  { %1867 = vrot.lane.b32.xlu0 %v1856_v52, %s3410_s1  ;;  %v2722_v5 = vmul.f32 -1.442695, %v1828_v1 }
 0xc47   :  { %1865 = vrot.lane.b32.xlu1 %v1855_v50, %s3410_s1  ;;  %v2721_v7 = vmul.f32 -1.442695, %v1827_v3 }
 0xc48   :  { %3293 = vpow2.f32 %v2722_v5 }
 0xc49   :  { %3295 = vpow2.f32 %v2721_v7 }
 0xc4e   :  { %v3290_v13 = vpop.eup %3289 }
 0xc4f   :  { %v3292_v17 = vpop.eup %3291  ;;  %v1842_v11 = vadd.f32 1.0, %v3290_v13 }
 0xc50   :  { %v1841_v15 = vadd.f32 1.0, %v3292_v17 }
 0xc51   :  { %3297 = vrcp.f32 %v1842_v11 }
 0xc52   :  { %v3294_v47 = vpop.eup %3293  ;;  %3299 = vrcp.f32 %v1841_v15 }
 0xc53   :  { %v3296_v49 = vpop.eup %3295  ;;  %v1844_v18 = vadd.f32 1.0, %v3294_v47 }
 0xc54   :  { %v1843_v54 = vadd.f32 1.0, %v3296_v49 }
 0xc55   :  { %3301 = vrcp.f32 %v1844_v18 }
 0xc56   :  { %3303 = vrcp.f32 %v1843_v54 }
 0xc5b   :  { %v3298_v20 = vpop.eup %3297 }
 0xc5c   :  { %v3300_v23 = vpop.eup %3299  ;;  %v1926_v50 = vmul.f32 %v3298_v20, %v4011_v32 }
 0xc5d   :  { %v1925_v62 = vmul.f32 %v3300_v23, %v4013_v36 }
 0xc5f   :  { %v3302_v35 = vpop.eup %3301 }
 0xc60   :  { %v3304_v27 = vpop.eup %3303  ;;  %v1904_v10 = vsub.f32 1.0, %v3302_v35  ;;  %v1928_v13 = vmul.f32 %v3302_v35, %v4021_v0 }
 0xc61   :  { %v1903_v7 = vsub.f32 1.0, %v3304_v27  ;;  %v1927_v32 = vmul.f32 %v3304_v27, %v4023_v41 }
 0xcb4   :  { %v1864_v58 = vpop.permute.xlu0 %1863 }
 0xcb5   :  { %v1874_v22 = vmul.f32 %v3298_v20, %v1864_v58  ;;  %v1862_v30 = vpop.permute.xlu1 %1861 }
 0xcb6   :  { %v1873_v25 = vmul.f32 %v3300_v23, %v1862_v30 }
 0xcb7   :  { %1883 = vrot.lane.b32.xlu0 %v1874_v22, %s3410_s1 }
 0xcb8   :  { %v1868_v40 = vpop.permute.xlu0 %1867  ;;  %1881 = vrot.lane.b32.xlu1 %v1873_v25, %s3410_s1 }
 0xcb9   :  { %v1876_v44 = vmul.f32 %v3302_v35, %v1868_v40  ;;  %v1866_v38 = vpop.permute.xlu1 %1865 }
 0xcba   :  { %v1875_v43 = vmul.f32 %v3304_v27, %v1866_v38 }
 0xcbb   :  { %1887 = vrot.lane.b32.xlu0 %v1876_v44, %s3410_s1 }
 0xcbc   :  { %1885 = vrot.lane.b32.xlu1 %v1875_v43, %s3410_s1 }
 0xd29   :  { %v1884_v29 = vpop.permute.xlu0 %1883 }
 0xd2a   :  { %v1894_v4 = vadd.f32 %v1884_v29, %v3785_v63  ;;  %v1882_v57 = vpop.permute.xlu1 %1881 }
 0xd2b   :  { %v1893_v8 = vadd.f32 %v1882_v57, %v3791_v2  ;;  %v1902_v2 = vsub.f32 1.0, %v3298_v20 }
 0xd2c   :  { %3305 = vtanh.f32 %v1894_v4 }
 0xd2d   :  { %3307 = vtanh.f32 %v1893_v8  ;;  %v1888_v60 = vpop.permute.xlu0 %1887 }
 0xd2e   :  { %v1896_v61 = vadd.f32 %v1888_v60, %v3799_v12  ;;  %v1886_v6 = vpop.permute.xlu1 %1885  ;;  %v1901_v12 = vsub.f32 1.0, %v3300_v23 }
 0xd2f   :  { %v1895_v26 = vadd.f32 %v1886_v6, %v3803_v16 }
 0xd30   :  { %3309 = vtanh.f32 %v1896_v61 }
 0xd31   :  { %3311 = vtanh.f32 %v1895_v26 }
 0xd36   :  { %v3306_v59 = vpop.eup %3305 }
 0xd37   :  { %v3308_v46 = vpop.eup %3307  ;;  %1911 = vrot.lane.b32.xlu0 %v3306_v59, %s3411_s4 }
 0xd38   :  { %1909 = vrot.lane.b32.xlu1 %v3308_v46, %s3411_s4 }
 0xd3a   :  { %v3310_v63 = vpop.eup %3309 }
 0xd3b   :  { %v3312_v52 = vpop.eup %3311  ;;  %1915 = vrot.lane.b32.xlu0 %v3310_v63, %s3411_s4 }
 0xd3c   :  { %1913 = vrot.lane.b32.xlu1 %v3312_v52, %s3411_s4 }
 0xda9   :  { %v1912_v33 = vpop.permute.xlu0 %1911 }
 0xdaa   :  { %v1922_v16 = vmul.f32 %v1912_v33, %v1902_v2  ;;  %v1910_v56 = vpop.permute.xlu1 %1909 }
 0xdab   :  { %v1921_v53 = vmul.f32 %v1910_v56, %v1901_v12 }
 0xdac   :  { %v4062_v1 = vadd.f32 %v1926_v50, %v1922_v16 }
 0xdad   :  { %v4064_v3 = vadd.f32 %v1925_v62, %v1921_v53  ;;  %v1916_v5 = vpop.permute.xlu0 %1915 }
 0xdae   :  { %v1924_v17 = vmul.f32 %v1916_v5, %v1904_v10  ;;  %1943 = vrot.lane.b32.xlu0 %v4062_v1, %s3411_s4  ;;  %v1914_v11 = vpop.permute.xlu1 %1913 }
 0xdaf   :  { %v1923_v47 = vmul.f32 %v1914_v11, %v1903_v7  ;;  %1941 = vrot.lane.b32.xlu1 %v4064_v3, %s3411_s4 }
 0xdb0   :  { %v4072_v36 = vadd.f32 %v1928_v13, %v1924_v17 }
 0xdb1   :  { %v4074_v15 = vadd.f32 %v1927_v32, %v1923_v47 }
 0xdb2   :  { %1947 = vrot.lane.b32.xlu0 %v4072_v36, %s3411_s4 }
 0xdb3   :  { %1945 = vrot.lane.b32.xlu1 %v4074_v15, %s3411_s4 }
 0xe20   :  { %v1944_v0 = vpop.permute.xlu0 %1943 }
 0xe21   :  { %v1942_v49 = vpop.permute.xlu1 %1941 }
 0xe22   :  { %3073 = vmatprep.mubr.msk.f32.mxu1 %vm70_vm0, %v1942_v49 }
 0xe23   :  { %3074 = vmatmul.mubr.msk.f32.vlgmr.msra.gmra.mrb[40].mxu1 %vm70_vm0, %v1944_v0 }
 0xe24   :  { %3182 = vmatpush3.bf16.msra.mxu1 %v3477_v9  ;;  %v1948_v18 = vpop.permute.xlu0 %1947 }
 0xe25   :  { %v1946_v41 = vpop.permute.xlu1 %1945  ;;  %3184 = vmatprep.subr.bf16.mxu1 %v3492_v14 }
 0xe26   :  { %3076 = vmatprep.mubr.msk.f32.mxu1 %vm70_vm0, %v1946_v41 }
 0xe27   :  { %3077 = vmatmul.mubr.msk.f32.gmra.mrb[42].mxu1 %vm70_vm0, %v1948_v18 }
 0xe28   :  { %3186 = vmatpush3.bf16.msra.mxu1 %v3492_v14 }
 0xef6   :  { %v3075_v54 = vpop.f32.mrb[40].mxu1 }
 0xef7   :  { %v2071_v20 = vadd.f32 %v3075_v54, %v3706_v55  ;;  %v2023_v58 = vpop.f32.mrb[41].mxu1  ;;  %v2043_v14 = vadd.f32 %v3075_v54, %v3806_v19 }
 0xef8   :  { %v2070_v23 = vadd.f32 %v2023_v58, %v3706_v55  ;;  %v2042_v35 = vadd.f32 %v2023_v58, %v3809_v21 }
 0xef9   :  { %2080 = vrot.lane.b32.xlu0 %v2071_v20, %s3410_s1  ;;  %v2728_v40 = vmul.f32 -1.442695, %v2043_v14 }
 0xefa   :  { %2078 = vrot.lane.b32.xlu1 %v2070_v23, %s3410_s1  ;;  %v3078_v9 = vpop.f32.mrb[42].mxu1  ;;  %v2727_v44 = vmul.f32 -1.442695, %v2042_v35 }
 0xefb   :  { %v2073_v22 = vadd.f32 %v3078_v9, %v3706_v55  ;;  %v2033_v30 = vpop.f32.mrb[43].mxu1  ;;  %v2045_v27 = vadd.f32 %v3078_v9, %v3812_v24  ;;  %3313 = vpow2.f32 %v2728_v40 }
 0xefc   :  { %v2072_v25 = vadd.f32 %v2033_v30, %v3706_v55  ;;  %v2044_v38 = vadd.f32 %v2033_v30, %v3815_v28  ;;  %3315 = vpow2.f32 %v2727_v44 }
 0xefd   :  { %2084 = vrot.lane.b32.xlu0 %v2073_v22, %s3410_s1  ;;  %v2730_v43 = vmul.f32 -1.442695, %v2045_v27 }
 0xefe   :  { %2082 = vrot.lane.b32.xlu1 %v2072_v25, %s3410_s1  ;;  %v2729_v29 = vmul.f32 -1.442695, %v2044_v38 }
 0xeff   :  { %3317 = vpow2.f32 %v2730_v43 }
 0xf00   :  { %3319 = vpow2.f32 %v2729_v29 }
 0xf05   :  { %v3314_v4 = vpop.eup %3313 }
 0xf06   :  { %v3316_v57 = vpop.eup %3315  ;;  %v2059_v8 = vadd.f32 1.0, %v3314_v4 }
 0xf07   :  { %v2058_v61 = vadd.f32 1.0, %v3316_v57 }
 0xf08   :  { %3321 = vrcp.f32 %v2059_v8 }
 0xf09   :  { %v3318_v60 = vpop.eup %3317  ;;  %3323 = vrcp.f32 %v2058_v61 }
 0xf0a   :  { %v3320_v6 = vpop.eup %3319  ;;  %v2061_v26 = vadd.f32 1.0, %v3318_v60 }
 0xf0b   :  { %v2060_v59 = vadd.f32 1.0, %v3320_v6 }
 0xf0c   :  { %3325 = vrcp.f32 %v2061_v26 }
 0xf0d   :  { %3327 = vrcp.f32 %v2060_v59 }
 0xf12   :  { %v3322_v46 = vpop.eup %3321 }
 0xf13   :  { %v3324_v52 = vpop.eup %3323  ;;  %v2143_v20 = vmul.f32 %v3322_v46, %v4062_v1 }
 0xf14   :  { %v2142_v23 = vmul.f32 %v3324_v52, %v4064_v3 }
 0xf16   :  { %v3326_v50 = vpop.eup %3325 }
 0xf17   :  { %v3328_v56 = vpop.eup %3327  ;;  %v2121_v30 = vsub.f32 1.0, %v3326_v50  ;;  %v2145_v40 = vmul.f32 %v3326_v50, %v4072_v36 }
 0xf18   :  { %v2120_v35 = vsub.f32 1.0, %v3328_v56  ;;  %v2144_v1 = vmul.f32 %v3328_v56, %v4074_v15 }
 0xf6b   :  { %v2081_v63 = vpop.permute.xlu0 %2080 }
 0xf6c   :  { %v2091_v2 = vmul.f32 %v3322_v46, %v2081_v63  ;;  %v2079_v33 = vpop.permute.xlu1 %2078 }
 0xf6d   :  { %v2090_v12 = vmul.f32 %v3324_v52, %v2079_v33 }
 0xf6e   :  { %2100 = vrot.lane.b32.xlu0 %v2091_v2, %s3410_s1 }
 0xf6f   :  { %v2085_v16 = vpop.permute.xlu0 %2084  ;;  %2098 = vrot.lane.b32.xlu1 %v2090_v12, %s3410_s1 }
 0xf70   :  { %v2093_v62 = vmul.f32 %v3326_v50, %v2085_v16  ;;  %v2083_v53 = vpop.permute.xlu1 %2082 }
 0xf71   :  { %v2092_v10 = vmul.f32 %v3328_v56, %v2083_v53 }
 0xf72   :  { %2104 = vrot.lane.b32.xlu0 %v2093_v62, %s3410_s1 }
 0xf73   :  { %2102 = vrot.lane.b32.xlu1 %v2092_v10, %s3410_s1 }
 0xfe0   :  { %v2101_v5 = vpop.permute.xlu0 %2100 }
 0xfe1   :  { %v2111_v7 = vadd.f32 %v2101_v5, %v3806_v19  ;;  %v2099_v13 = vpop.permute.xlu1 %2098 }
 0xfe2   :  { %v2110_v17 = vadd.f32 %v2099_v13, %v3809_v21  ;;  %v2119_v21 = vsub.f32 1.0, %v3322_v46 }
 0xfe3   :  { %3329 = vtanh.f32 %v2111_v7 }
 0xfe4   :  { %3331 = vtanh.f32 %v2110_v17  ;;  %v2105_v11 = vpop.permute.xlu0 %2104 }
 0xfe5   :  { %v2113_v32 = vadd.f32 %v2105_v11, %v3812_v24  ;;  %v2103_v47 = vpop.permute.xlu1 %2102  ;;  %v2118_v24 = vsub.f32 1.0, %v3324_v52 }
 0xfe6   :  { %v2112_v0 = vadd.f32 %v2103_v47, %v3815_v28 }
 0xfe7   :  { %3333 = vtanh.f32 %v2113_v32 }
 0xfe8   :  { %3335 = vtanh.f32 %v2112_v0 }
 0xfed   :  { %v3330_v49 = vpop.eup %3329 }
 0xfee   :  { %v3332_v41 = vpop.eup %3331  ;;  %2128 = vrot.lane.b32.xlu0 %v3330_v49, %s3411_s4 }
 0xfef   :  { %2126 = vrot.lane.b32.xlu1 %v3332_v41, %s3411_s4 }
 0xff1   :  { %v3334_v19 = vpop.eup %3333 }
 0xff2   :  { %v3336_v18 = vpop.eup %3335  ;;  %2132 = vrot.lane.b32.xlu0 %v3334_v19, %s3411_s4 }
 0xff3   :  { %2130 = vrot.lane.b32.xlu1 %v3336_v18, %s3411_s4 }
0x1060   :  { %v2129_v54 = vpop.permute.xlu0 %2128 }
0x1061   :  { %v2139_v28 = vmul.f32 %v2129_v54, %v2119_v21  ;;  %v2127_v58 = vpop.permute.xlu1 %2126 }
0x1062   :  { %v2138_v9 = vmul.f32 %v2127_v58, %v2118_v24 }
0x1063   :  { %v4113_v22 = vadd.f32 %v2143_v20, %v2139_v28 }
0x1064   :  { %v4115_v25 = vadd.f32 %v2142_v23, %v2138_v9  ;;  %v2133_v14 = vpop.permute.xlu0 %2132 }
0x1065   :  { %v2141_v27 = vmul.f32 %v2133_v14, %v2121_v30  ;;  %2160 = vrot.lane.b32.xlu0 %v4113_v22, %s3411_s4  ;;  %v2131_v44 = vpop.permute.xlu1 %2130 }
0x1066   :  { %v2140_v38 = vmul.f32 %v2131_v44, %v2120_v35  ;;  %2158 = vrot.lane.b32.xlu1 %v4115_v25, %s3411_s4 }
0x1067   :  { %v4123_v3 = vadd.f32 %v2145_v40, %v2141_v27 }
0x1068   :  { %v4125_v43 = vadd.f32 %v2144_v1, %v2140_v38 }
0x1069   :  { %2164 = vrot.lane.b32.xlu0 %v4123_v3, %s3411_s4 }
0x106a   :  { %2162 = vrot.lane.b32.xlu1 %v4125_v43, %s3411_s4 }
0x10d7   :  { %v2161_v36 = vpop.permute.xlu0 %2160 }
0x10d8   :  { %v2159_v29 = vpop.permute.xlu1 %2158 }
0x10d9   :  { %3087 = vmatprep.mubr.msk.f32.mxu0 %vm70_vm0, %v2159_v29 }
0x10da   :  { %3088 = vmatmul.mubr.msk.f32.vlgmr.msra.gmra.mrb[44].mxu0 %vm70_vm0, %v2161_v36 }
0x10db   :  { %v2165_v4 = vpop.permute.xlu0 %2164 }
0x10dc   :  { %v2163_v15 = vpop.permute.xlu1 %2162 }
0x10dd   :  { %3090 = vmatprep.mubr.msk.f32.mxu0 %vm70_vm0, %v2163_v15 }
0x10de   :  { %3091 = vmatmul.mubr.msk.f32.gmra.mrb[46].mxu0 %vm70_vm0, %v2165_v4 }
0x11ad   :  { %v3089_v57 = vpop.f32.mrb[44].mxu0 }
0x11ae   :  { %v2288_v8 = vadd.f32 %v3089_v57, %v3706_v55  ;;  %v2240_v60 = vpop.f32.mrb[45].mxu0  ;;  %v2260_v63 = vadd.f32 %v3089_v57, %v3818_v31 }
0x11af   :  { %v2287_v61 = vadd.f32 %v2240_v60, %v3706_v55  ;;  %v2259_v52 = vadd.f32 %v2240_v60, %v3821_v34 }
0x11b0   :  { %2297 = vrot.lane.b32.xlu0 %v2288_v8, %s3410_s1  ;;  %v2736_v2 = vmul.f32 -1.442695, %v2260_v63 }
0x11b1   :  { %2295 = vrot.lane.b32.xlu1 %v2287_v61, %s3410_s1  ;;  %v3092_v6 = vpop.f32.mrb[46].mxu0  ;;  %v2735_v12 = vmul.f32 -1.442695, %v2259_v52 }
0x11b2   :  { %v2290_v26 = vadd.f32 %v3092_v6, %v3706_v55  ;;  %v2250_v59 = vpop.f32.mrb[47].mxu0  ;;  %v2262_v33 = vadd.f32 %v3092_v6, %v3824_v37  ;;  %3337 = vpow2.f32 %v2736_v2 }
0x11b3   :  { %v2289_v46 = vadd.f32 %v2250_v59, %v3706_v55  ;;  %v2261_v50 = vadd.f32 %v2250_v59, %v3827_v39  ;;  %3339 = vpow2.f32 %v2735_v12 }
0x11b4   :  { %2301 = vrot.lane.b32.xlu0 %v2290_v26, %s3410_s1  ;;  %v2738_v16 = vmul.f32 -1.442695, %v2262_v33 }
0x11b5   :  { %2299 = vrot.lane.b32.xlu1 %v2289_v46, %s3410_s1  ;;  %v2737_v56 = vmul.f32 -1.442695, %v2261_v50 }
0x11b6   :  { %3341 = vpow2.f32 %v2738_v16 }
0x11b7   :  { %3343 = vpow2.f32 %v2737_v56 }
0x11bc   :  { %v3338_v62 = vpop.eup %3337 }
0x11bd   :  { %v3340_v53 = vpop.eup %3339  ;;  %v2276_v10 = vadd.f32 1.0, %v3338_v62 }
0x11be   :  { %v2275_v7 = vadd.f32 1.0, %v3340_v53 }
0x11bf   :  { %3345 = vrcp.f32 %v2276_v10 }
0x11c0   :  { %v3342_v5 = vpop.eup %3341  ;;  %3347 = vrcp.f32 %v2275_v7 }
0x11c1   :  { %v3344_v13 = vpop.eup %3343  ;;  %v2278_v17 = vadd.f32 1.0, %v3342_v5 }
0x11c2   :  { %v2277_v11 = vadd.f32 1.0, %v3344_v13 }
0x11c3   :  { %3349 = vrcp.f32 %v2278_v17 }
0x11c4   :  { %3351 = vrcp.f32 %v2277_v11 }
0x11c9   :  { %v3346_v32 = vpop.eup %3345 }
0x11ca   :  { %v3348_v0 = vpop.eup %3347  ;;  %v2360_v29 = vmul.f32 %v3346_v32, %v4113_v22 }
0x11cb   :  { %v2359_v4 = vmul.f32 %v3348_v0, %v4115_v25 }
0x11cd   :  { %v3350_v18 = vpop.eup %3349 }
0x11ce   :  { %v3352_v54 = vpop.eup %3351  ;;  %v2338_v60 = vsub.f32 1.0, %v3350_v18  ;;  %v2362_v59 = vmul.f32 %v3350_v18, %v4123_v3 }
0x11cf   :  { %v2337_v26 = vsub.f32 1.0, %v3352_v54  ;;  %v2361_v22 = vmul.f32 %v3352_v54, %v4125_v43 }
0x1222   :  { %v2298_v47 = vpop.permute.xlu0 %2297 }
0x1223   :  { %v2308_v49 = vmul.f32 %v3346_v32, %v2298_v47  ;;  %v2296_v41 = vpop.permute.xlu1 %2295 }
0x1224   :  { %v2307_v19 = vmul.f32 %v3348_v0, %v2296_v41 }
0x1225   :  { %2317 = vrot.lane.b32.xlu0 %v2308_v49, %s3410_s1 }
0x1226   :  { %v2302_v21 = vpop.permute.xlu0 %2301  ;;  %2315 = vrot.lane.b32.xlu1 %v2307_v19, %s3410_s1 }
0x1227   :  { %v2310_v24 = vmul.f32 %v3350_v18, %v2302_v21  ;;  %v2300_v20 = vpop.permute.xlu1 %2299 }
0x1228   :  { %v2309_v28 = vmul.f32 %v3352_v54, %v2300_v20 }
0x1229   :  { %2321 = vrot.lane.b32.xlu0 %v2310_v24, %s3410_s1 }
0x122a   :  { %2319 = vrot.lane.b32.xlu1 %v2309_v28, %s3410_s1 }
0x1297   :  { %v2318_v58 = vpop.permute.xlu0 %2317 }
0x1298   :  { %v2328_v23 = vadd.f32 %v2318_v58, %v3818_v31  ;;  %v2316_v9 = vpop.permute.xlu1 %2315 }
0x1299   :  { %v2327_v30 = vadd.f32 %v2316_v9, %v3821_v34  ;;  %v2336_v34 = vsub.f32 1.0, %v3346_v32 }
0x129a   :  { %3353 = vtanh.f32 %v2328_v23 }
0x129b   :  { %3355 = vtanh.f32 %v2327_v30  ;;  %v2322_v14 = vpop.permute.xlu0 %2321 }
0x129c   :  { %v2330_v35 = vadd.f32 %v2322_v14, %v3824_v37  ;;  %v2320_v40 = vpop.permute.xlu1 %2319  ;;  %v2335_v37 = vsub.f32 1.0, %v3348_v0 }
0x129d   :  { %v2329_v27 = vadd.f32 %v2320_v40, %v3827_v39 }
0x129e   :  { %3357 = vtanh.f32 %v2330_v35 }
0x129f   :  { %3359 = vtanh.f32 %v2329_v27 }
0x12a4   :  { %v3354_v44 = vpop.eup %3353 }
0x12a5   :  { %v3356_v1 = vpop.eup %3355  ;;  %2345 = vrot.lane.b32.xlu0 %v3354_v44, %s3411_s4 }
0x12a6   :  { %2343 = vrot.lane.b32.xlu1 %v3356_v1, %s3411_s4 }
0x12a8   :  { %v3358_v31 = vpop.eup %3357 }
0x12a9   :  { %v3360_v38 = vpop.eup %3359  ;;  %2349 = vrot.lane.b32.xlu0 %v3358_v31, %s3411_s4 }
0x12aa   :  { %2347 = vrot.lane.b32.xlu1 %v3360_v38, %s3411_s4 }
0x1317   :  { %v2346_v36 = vpop.permute.xlu0 %2345 }
0x1318   :  { %v2356_v39 = vmul.f32 %v2346_v36, %v2336_v34  ;;  %v2344_v15 = vpop.permute.xlu1 %2343 }
0x1319   :  { %v2355_v57 = vmul.f32 %v2344_v15, %v2335_v37 }
0x131a   :  { %v4161_v8 = vadd.f32 %v2360_v29, %v2356_v39 }
0x131b   :  { %v4163_v61 = vadd.f32 %v2359_v4, %v2355_v57  ;;  %v2350_v6 = vpop.permute.xlu0 %2349 }
0x131c   :  { %v2358_v46 = vmul.f32 %v2350_v6, %v2338_v60  ;;  %2377 = vrot.lane.b32.xlu0 %v4161_v8, %s3411_s4  ;;  %v2348_v63 = vpop.permute.xlu1 %2347 }
0x131d   :  { %v2357_v52 = vmul.f32 %v2348_v63, %v2337_v26  ;;  %2375 = vrot.lane.b32.xlu1 %v4163_v61, %s3411_s4 }
0x131e   :  { %v4171_v25 = vadd.f32 %v2362_v59, %v2358_v46 }
0x131f   :  { %v4173_v2 = vadd.f32 %v2361_v22, %v2357_v52 }
0x1320   :  { %2381 = vrot.lane.b32.xlu0 %v4171_v25, %s3411_s4 }
0x1321   :  { %2379 = vrot.lane.b32.xlu1 %v4173_v2, %s3411_s4 }
0x138e   :  { %v2378_v3 = vpop.permute.xlu0 %2377 }
0x138f   :  { %v2376_v33 = vpop.permute.xlu1 %2375 }
0x1390   :  { %3101 = vmatprep.mubr.msk.f32.mxu1 %vm70_vm0, %v2376_v33 }
0x1391   :  { %3102 = vmatmul.mubr.msk.f32.vlgmr.msra.gmra.mrb[44].mxu1 %vm70_vm0, %v2378_v3 }
0x1392   :  { %v2382_v12 = vpop.permute.xlu0 %2381 }
0x1393   :  { %v2380_v43 = vpop.permute.xlu1 %2379 }
0x1394   :  { %3104 = vmatprep.mubr.msk.f32.mxu1 %vm70_vm0, %v2380_v43 }
0x1395   :  { %3105 = vmatmul.mubr.msk.f32.gmra.mrb[46].mxu1 %vm70_vm0, %v2382_v12 }
0x1464   :  { %v3103_v50 = vpop.f32.mrb[44].mxu1 }
0x1465   :  { %v2505_v16 = vadd.f32 %v3103_v50, %v3706_v55  ;;  %v2457_v56 = vpop.f32.mrb[45].mxu1  ;;  %v2477_v13 = vadd.f32 %v3103_v50, %v3830_v42 }
0x1466   :  { %v2504_v62 = vadd.f32 %v2457_v56, %v3706_v55  ;;  %v2476_v17 = vadd.f32 %v2457_v56, %v3833_v45 }
0x1467   :  { %2514 = vrot.lane.b32.xlu0 %v2505_v16, %s3410_s1  ;;  %v2744_v11 = vmul.f32 -1.442695, %v2477_v13 }
0x1468   :  { %2512 = vrot.lane.b32.xlu1 %v2504_v62, %s3410_s1  ;;  %v3106_v53 = vpop.f32.mrb[46].mxu1  ;;  %v2743_v47 = vmul.f32 -1.442695, %v2476_v17 }
0x1469   :  { %v2507_v10 = vadd.f32 %v3106_v53, %v3706_v55  ;;  %v2467_v5 = vpop.f32.mrb[47].mxu1  ;;  %v2479_v32 = vadd.f32 %v3106_v53, %v3836_v48  ;;  %3361 = vpow2.f32 %v2744_v11 }
0x146a   :  { %v2506_v7 = vadd.f32 %v2467_v5, %v3706_v55  ;;  %v2478_v0 = vadd.f32 %v2467_v5, %v3839_v51  ;;  %3363 = vpow2.f32 %v2743_v47 }
0x146b   :  { %2518 = vrot.lane.b32.xlu0 %v2507_v10, %s3410_s1  ;;  %v2746_v49 = vmul.f32 -1.442695, %v2479_v32 }
0x146c   :  { %2516 = vrot.lane.b32.xlu1 %v2506_v7, %s3410_s1  ;;  %v2745_v41 = vmul.f32 -1.442695, %v2478_v0 }
0x146d   :  { %3365 = vpow2.f32 %v2746_v49 }
0x146e   :  { %3367 = vpow2.f32 %v2745_v41 }
0x1473   :  { %v3362_v55 = vpop.eup %3361 }
0x1474   :  { %v3364_v19 = vpop.eup %3363  ;;  %v2493_v18 = vadd.f32 1.0, %v3362_v55 }
0x1475   :  { %v2492_v54 = vadd.f32 1.0, %v3364_v19 }
0x1476   :  { %3369 = vrcp.f32 %v2493_v18 }
0x1477   :  { %v3366_v21 = vpop.eup %3365  ;;  %3371 = vrcp.f32 %v2492_v54 }
0x1478   :  { %v3368_v24 = vpop.eup %3367  ;;  %v2495_v20 = vadd.f32 1.0, %v3366_v21 }
0x1479   :  { %v2494_v28 = vadd.f32 1.0, %v3368_v24 }
0x147a   :  { %3373 = vrcp.f32 %v2495_v20 }
0x147b   :  { %3375 = vrcp.f32 %v2494_v28 }
0x1480   :  { %v3370_v58 = vpop.eup %3369 }
0x1481   :  { %v3372_v9 = vpop.eup %3371  ;;  %v2577_v46 = vmul.f32 %v3370_v58, %v4161_v8 }
0x1482   :  { %v2576_v22 = vmul.f32 %v3372_v9, %v4163_v61 }
0x1484   :  { %v3374_v40 = vpop.eup %3373 }
0x1485   :  { %v3376_v44 = vpop.eup %3375  ;;  %v2555_v33 = vsub.f32 1.0, %v3374_v40  ;;  %v2579_v16 = vmul.f32 %v3374_v40, %v4171_v25 }
0x1486   :  { %v2554_v50 = vsub.f32 1.0, %v3376_v44  ;;  %v2578_v53 = vmul.f32 %v3376_v44, %v4173_v2 }
0x14d9   :  { %v2515_v23 = vpop.permute.xlu0 %2514 }
0x14da   :  { %v2525_v30 = vmul.f32 %v3370_v58, %v2515_v23  ;;  %v2513_v14 = vpop.permute.xlu1 %2512 }
0x14db   :  { %v2524_v35 = vmul.f32 %v3372_v9, %v2513_v14 }
0x14dc   :  { %2534 = vrot.lane.b32.xlu0 %v2525_v30, %s3410_s1 }
0x14dd   :  { %v2519_v27 = vpop.permute.xlu0 %2518  ;;  %2532 = vrot.lane.b32.xlu1 %v2524_v35, %s3410_s1 }
0x14de   :  { %v2527_v1 = vmul.f32 %v3374_v40, %v2519_v27  ;;  %v2517_v31 = vpop.permute.xlu1 %2516 }
0x14df   :  { %v2526_v38 = vmul.f32 %v3376_v44, %v2517_v31 }
0x14e0   :  { %2538 = vrot.lane.b32.xlu0 %v2527_v1, %s3410_s1 }
0x14e1   :  { %2536 = vrot.lane.b32.xlu1 %v2526_v38, %s3410_s1 }
0x154e   :  { %v2535_v34 = vpop.permute.xlu0 %2534 }
0x154f   :  { %v2545_v36 = vadd.f32 %v2535_v34, %v3830_v42  ;;  %v2533_v37 = vpop.permute.xlu1 %2532 }
0x1550   :  { %v2544_v29 = vadd.f32 %v2533_v37, %v3833_v45  ;;  %v2553_v45 = vsub.f32 1.0, %v3370_v58 }
0x1551   :  { %3377 = vtanh.f32 %v2545_v36 }
0x1552   :  { %3379 = vtanh.f32 %v2544_v29  ;;  %v2539_v39 = vpop.permute.xlu0 %2538 }
0x1553   :  { %v2547_v15 = vadd.f32 %v2539_v39, %v3836_v48  ;;  %v2537_v4 = vpop.permute.xlu1 %2536  ;;  %v2552_v48 = vsub.f32 1.0, %v3372_v9 }
0x1554   :  { %v2546_v57 = vadd.f32 %v2537_v4, %v3839_v51 }
0x1555   :  { %3381 = vtanh.f32 %v2547_v15 }
0x1556   :  { %3383 = vtanh.f32 %v2546_v57 }
0x155b   :  { %v3378_v60 = vpop.eup %3377 }
0x155c   :  { %v3380_v6 = vpop.eup %3379  ;;  %2562 = vrot.lane.b32.xlu0 %v3378_v60, %s3411_s4 }
0x155d   :  { %2560 = vrot.lane.b32.xlu1 %v3380_v6, %s3411_s4 }
0x155f   :  { %v3382_v42 = vpop.eup %3381 }
0x1560   :  { %v3384_v26 = vpop.eup %3383  ;;  %2566 = vrot.lane.b32.xlu0 %v3382_v42, %s3411_s4 }
0x1561   :  { %2564 = vrot.lane.b32.xlu1 %v3384_v26, %s3411_s4 }
0x15ce   :  { %v2563_v59 = vpop.permute.xlu0 %2562 }
0x15cf   :  { %v2573_v51 = vmul.f32 %v2563_v59, %v2553_v45  ;;  %v2561_v63 = vpop.permute.xlu1 %2560 }
0x15d0   :  { %v2572_v52 = vmul.f32 %v2561_v63, %v2552_v48 }
0x15d1   :  { %v2581_v3 = vadd.f32 %v2577_v46, %v2573_v51 }
0x15d2   :  { %v2580_v43 = vadd.f32 %v2576_v22, %v2572_v52  ;;  %v2567_v12 = vpop.permute.xlu0 %2566 }
0x15d3   :  { %v2575_v56 = vmul.f32 %v2567_v12, %v2555_v33  ;;  %2590 = vrot.lane.b32.xlu0 %v2581_v3, %s3411_s4  ;;  %v2565_v62 = vpop.permute.xlu1 %2564 }
0x15d4   :  { %v2574_v10 = vmul.f32 %v2565_v62, %v2554_v50  ;;  %2588 = vrot.lane.b32.xlu1 %v2580_v43, %s3411_s4 }
0x15d5   :  { %v2583_v8 = vadd.f32 %v2579_v16, %v2575_v56 }
0x15d6   :  { %v2582_v5 = vadd.f32 %v2578_v53, %v2574_v10 }
0x15d7   :  { %2594 = vrot.lane.b32.xlu0 %v2583_v8, %s3411_s4 }
0x15d8   :  { %2592 = vrot.lane.b32.xlu1 %v2582_v5, %s3411_s4 }
0x1645   :  { %v2591_v61 = vpop.permute.xlu0 %2590 }
0x1646   :  { %2601 = vst.msk [vmem:[#allocation3 + $0x8] sm:$0xff] %vm70_vm0, %v2591_v61  ;;  %v2589_v25 = vpop.permute.xlu1 %2588 }
0x1647   :  { %2600 = vst.msk [vmem:[#allocation3] sm:$0xff] %vm70_vm0, %v2589_v25 }
0x1649   :  { %v2595_v7 = vpop.permute.xlu0 %2594 }
0x164a   :  { %2603 = vst.msk [vmem:[#allocation3 + $0x18] sm:$0xff] %vm70_vm0, %v2595_v7  ;;  %v2593_v2 = vpop.permute.xlu1 %2592 }
0x164b   :  { %2602 = vst.msk [vmem:[#allocation3 + $0x10] sm:$0xff] %vm70_vm0, %v2593_v2 }
0x164c   :  { %3396 = shalt.err (!%p3393_p4)
}
0x164d   :  { %s3397_s21 = scalar_lea.hbm %s4238_s7, 512 }
0x164e   :  { %p3398_p5 = scmp.ne.s32.totalorder %s4238_s7, %s3397_s21  ;;  %p3401_p6 = scmp.lt.u32.totalorder %s3397_s21, %s4238_s7 }
0x1650   :  { %p3403_p7 = pnand %p3401_p6, %p3398_p5 }
0x1652   :  { %3406 = shalt.err (!%p3403_p7)
}
0x1653   :  { %s3413_s5 = smov 128   ;;  %s3414_s26 = smov 8  }
0x1654   :  { %2615 = dma.vmem_to_hbm [thread:$0]  %s2610_s17, 512, %s4238_s7, [#allocation4], %s3413_s5, %s3413_s5, %s3414_s26  }
0x1655   :  { %3407 = dma.done.wait [#allocation4], 512  }
0x1656   :  { %3408 = vsyncadd [#allocation4], 4294966784 }
0x1657   :  { %2619 = vsyncpa [#allocation4], 1 }

</bundles_post_ra>
